<compile_context>
chip_gen: v7x
topology: tpu7x:2x2x1
jax: 0.10.0
libtpu: 0.0.40
codegen_flags: <defaults>
</compile_context>

<pallas_src>
import functools

import jax
import jax.numpy as jnp
from jax import lax
from jax.experimental import pallas as pl
from jax.experimental.pallas import tpu as pltpu

C_PAD = 128          # lane-padded feature width used by all attention stages
FFN_HIDDEN = 128
RES_CHANNELS = 1024
LEAKY_SLOPE = 0.2


# ----------------------------------------------------------------------------
# Pallas kernels
# ----------------------------------------------------------------------------

def _edgeconv_kernel(e_ref, w_ref, o_ref, *, k_nbr):
    """EdgeConv: 1x1 conv over edge features + LeakyReLU + max over K.

    e_ref: (K, T, 2*cin) bf16   edge features for one row-tile of B*N points
    w_ref: (2*cin, C_PAD) bf16  1x1-conv weight, zero-padded to 128 lanes with
                                the layer's channels at its column offset
    o_ref: (T, C_PAD)     f32   lane-dense output slab
    """
    w = w_ref[...]
    acc = None
    for kk in range(k_nbr):                      # K is small & static: unroll
        h = jnp.dot(e_ref[kk], w, preferred_element_type=jnp.float32)
        h = jnp.where(h > 0.0, h, LEAKY_SLOPE * h)          # LeakyReLU(0.2)
        acc = h if acc is None else jnp.maximum(acc, h)      # VPU max of slabs
    o_ref[...] = acc


def _attn_res_kernel(x_ref, wqkv_ref, w1_ref, w2_ref, wc_ref,
                     feat_ref, res_ref, *, scale, cpad):
    """Self-attention + FFN, fused with the res-link Conv1d(C,1024)+max.

    One batch item per grid step.  All channel dims are zero-padded to `cpad`
    lanes (padded weight rows/cols are zero, so numerics are unchanged).

    x_ref:    (1, n, cpad)    bf16
    wqkv_ref: (cpad, 3*cpad)  bf16   packed q/k/v projection
    w1_ref:   (cpad, H) bf16; w2_ref: (H, cpad) bf16; wc_ref: (cpad, 1024) bf16
    feat_ref: (1, n, cpad) bf16;  res_ref: (1, 1, 1024) f32
    """
    x = x_ref[0]                                                      # (n, cpad)
    qkv = jnp.dot(x, wqkv_ref[...], preferred_element_type=jnp.float32)
    q = qkv[:, 0 * cpad:1 * cpad].astype(jnp.bfloat16)
    k = qkv[:, 1 * cpad:2 * cpad].astype(jnp.bfloat16)
    v = qkv[:, 2 * cpad:3 * cpad].astype(jnp.bfloat16)

    # TODO(synk): at production N (>=1024) tile this flash-style over a KV grid
    # axis with online softmax; the full (n,n) score fits VMEM at these sizes.
    s = lax.dot_general(q, k, (((1,), (1,)), ((), ())),
                        preferred_element_type=jnp.float32) * scale    # (n, n)
    s = s - jnp.max(s, axis=-1, keepdims=True)
    p = jnp.exp(s)
    p = p * pl.reciprocal(jnp.sum(p, axis=-1, keepdims=True), approx=True)

    y = x.astype(jnp.float32) + jnp.dot(p.astype(jnp.bfloat16), v,
                                        preferred_element_type=jnp.float32)
    h = jnp.dot(y.astype(jnp.bfloat16), w1_ref[...],
                preferred_element_type=jnp.float32)
    h = jnp.where(h > 0.0, h, LEAKY_SLOPE * h)                        # LeakyReLU
    f = jnp.dot(h.astype(jnp.bfloat16), w2_ref[...],
                preferred_element_type=jnp.float32)                   # (n, cpad)
    feat_ref[0] = f.astype(feat_ref.dtype)

    # Fused res-link: Conv1d(C, 1024, 1, bias=False) + max over points.
    g = jnp.dot(f.astype(jnp.bfloat16), wc_ref[...],
                preferred_element_type=jnp.float32)                   # (n, 1024)
    res_ref[0] = jnp.max(g, axis=0, keepdims=True)


# ----------------------------------------------------------------------------
# Wrappers around pallas_call
# ----------------------------------------------------------------------------

def _pick_tile(n):
    for t in (512, 256, 128, 64, 32, 16, 8):
        if n % t == 0:
            return t
    return n


def edgeconv(x_bnc, w_pad_bf16, k_nbr):
    """x: (B, N, C) f32 -> (B, N, C_PAD) f32 lane-dense slab.

    The layer's real channels occupy the column range baked into the padded
    weight; all other columns are exactly zero.
    """
    B, N, C = x_bnc.shape
    BN = B * N
    # TODO(synk): kNN top-k + neighbor gather are data-dependent indexing; kept
    # in JAX.  At production N, move the gather into the kernel with
    # PrefetchScalarGridSpec scalar-prefetched indices to avoid the K x HBM blowup.
    d = -jnp.sum((x_bnc[:, :, None, :] - x_bnc[:, None, :, :]) ** 2, axis=-1)
    idx = lax.top_k(d, k_nbr)[1]                                      # (B, N, K)
    nbr = jax.vmap(lambda xb, ib: xb[ib])(x_bnc, idx)                 # (B, N, K, C)
    ctr = jnp.broadcast_to(x_bnc[:, :, None, :], nbr.shape)
    e = jnp.concatenate([ctr, nbr - ctr], axis=-1)                    # (B, N, K, 2C)
    # (K, B*N, 2C) so the in-kernel max over K is an elementwise max of slabs.
    e = jnp.transpose(e, (2, 0, 1, 3)).reshape(k_nbr, BN, 2 * C)
    e = e.astype(jnp.bfloat16)

    tile = _pick_tile(BN)
    out = pl.pallas_call(
        functools.partial(_edgeconv_kernel, k_nbr=k_nbr),
        out_shape=jax.ShapeDtypeStruct((BN, C_PAD), jnp.float32),
        grid=(BN // tile,),
        in_specs=[
            pl.BlockSpec((k_nbr, tile, 2 * C), lambda i: (0, i, 0)),
            pl.BlockSpec((2 * C, C_PAD), lambda i: (0, 0)),
        ],
        out_specs=pl.BlockSpec((tile, C_PAD), lambda i: (i, 0)),
        compiler_params=pltpu.CompilerParams(
            dimension_semantics=("parallel",)),
    )(e, w_pad_bf16)
    return out.reshape(B, N, C_PAD)


def attention_res_block(x_bnc, attn_params, conv_w):
    """x: (B, N, C_PAD) bf16 -> (features (B,N,C_PAD) bf16, res-link (B,1024) f32)."""
    B, N, Cp = x_bnc.shape
    wqkv, w1, w2, scale = attn_params
    feat, res = pl.pallas_call(
        functools.partial(_attn_res_kernel, scale=scale, cpad=Cp),
        out_shape=(jax.ShapeDtypeStruct((B, N, Cp), jnp.bfloat16),
                   jax.ShapeDtypeStruct((B, 1, RES_CHANNELS), jnp.float32)),
        grid=(B,),
        in_specs=[
            pl.BlockSpec((1, N, Cp), lambda b: (b, 0, 0)),
            pl.BlockSpec(wqkv.shape, lambda b: (0, 0)),
            pl.BlockSpec(w1.shape, lambda b: (0, 0)),
            pl.BlockSpec(w2.shape, lambda b: (0, 0)),
            pl.BlockSpec(conv_w.shape, lambda b: (0, 0)),
        ],
        out_specs=(
            pl.BlockSpec((1, N, Cp), lambda b: (b, 0, 0)),
            pl.BlockSpec((1, 1, RES_CHANNELS), lambda b: (b, 0, 0)),
        ),
        compiler_params=pltpu.CompilerParams(
            dimension_semantics=("parallel",)),    # batch shards across v7x TCs
    )(x_bnc, wqkv, w1, w2, conv_w)
    return feat, res[:, 0, :]


def downsample_global(x_feat, x_xyz, w_score, m):
    """DownSampleGlobal: learned per-point score -> keep top-M points."""
    # TODO(synk): top-k selection + gather are data-dependent; kept in plain JAX.
    score = jnp.einsum("bnc,c->bn", x_feat.astype(jnp.float32), w_score)
    idx = lax.top_k(score, m)[1]                                      # (B, M)
    x_ds = jax.vmap(lambda xb, ib: xb[ib])(x_feat, idx)
    xyz_ds = jax.vmap(lambda xb, ib: xb[ib])(x_xyz, idx)
    return x_ds, xyz_ds, idx


# ----------------------------------------------------------------------------
# FeatureLearningBlock forward (res_link_enable=True, fps=False path)
# ----------------------------------------------------------------------------

def feature_learning_block(params, x_bcn):
    """x_bcn: (B, 3, N) in the PyTorch Conv1d layout."""
    x = jnp.transpose(x_bcn, (0, 2, 1)).astype(jnp.float32)           # (B, N, 3)
    x_xyz = x

    # Embedding: EdgeConv layers, each consuming the previous output.  Layer l
    # writes its channels into cols [off_l, off_l+cout_l) of a C_PAD slab, so
    # the torch.cat over embeddings is a plain elementwise add of the slabs.
    edge_cout = params["edgeconv_cout"]
    slabs = []
    h = x
    off = 0
    for li, (w_e, k_nbr) in enumerate(zip(params["edgeconv_w"],
                                          params["edgeconv_K"])):
        s = edgeconv(h, w_e, k_nbr)                       # (B, N, C_PAD)
        slabs.append(s)
        h = lax.slice_in_dim(s, off, off + edge_cout[li], axis=2)
        off += edge_cout[li]
    x_feat = functools.reduce(jnp.add, slabs).astype(jnp.bfloat16)    # lane-dense

    # Attention stage 0 + fused res-link conv/max.
    x_feat, res0 = attention_res_block(x_feat, params["attn"][0],
                                       params["conv_w"][0])
    res_link_list = [res0]

    for i, m in enumerate(params["M_list"]):
        x_feat, x_xyz, _idx = downsample_global(x_feat, x_xyz, params["ds_w"][i], m)
        x_feat, res = attention_res_block(x_feat, params["attn"][i + 1],
                                          params["conv_w"][i + 1])
        res_link_list.append(res)

    out = jnp.concatenate(res_link_list, axis=1)                      # (B, 1024*L)
    return out, res_link_list


# ----------------------------------------------------------------------------
# Deterministic parameter init (shapes implied by the module config).
# Weights are zero-padded to C_PAD lanes so kernel stores are lane-dense;
# the padded rows/cols are zero, so the math is unchanged.
# ----------------------------------------------------------------------------

def init_params(key):
    edgeconv_K = [8, 8]            # config.embedding.K
    edgeconv_cout = [32, 32]       # embedding output channels per layer
    attn_cout = [64, 64, 64]       # config.attention.ff_conv2_channels_out
    M_list = [32, 16]              # config.downsample.M

    keys = iter(jax.random.split(key, 64))

    def init(shape):
        fan_in = shape[0]
        return (jax.random.normal(next(keys), shape, jnp.float32)
                / jnp.sqrt(jnp.float32(fan_in)))

    def pad_to(w, shape, offsets=None):
        out = jnp.zeros(shape, w.dtype)
        if offsets is None:
            offsets = (0,) * w.ndim
        sl = tuple(slice(o, o + s) for o, s in zip(offsets, w.shape))
        return out.at[sl].set(w)

    # EdgeConv weights: actual (2*C_in, C_out), placed at the layer's column
    # offset inside a (2*C_in, C_PAD) container (bf16 for the MXU).
    edgeconv_cin = [3] + edgeconv_cout[:-1]
    edgeconv_w = []
    off = 0
    for cin, cout in zip(edgeconv_cin, edgeconv_cout):
        w = init((2 * cin, cout))
        edgeconv_w.append(pad_to(w, (2 * cin, C_PAD), (0, off)).astype(jnp.bfloat16))
        off += cout

    # Attention layers: layer 0 eats the cat of embeddings, later layers eat
    # the previous layer's output.  q/k/v packed into one (C_PAD, 3*C_PAD) mat.
    attn_cin = [sum(edgeconv_cout)] + attn_cout[:-1]
    attn = []
    for cin, cout in zip(attn_cin, attn_cout):
        wq, wk, wv = init((cin, cin)), init((cin, cin)), init((cin, cin))
        w1, w2 = init((cin, FFN_HIDDEN)), init((FFN_HIDDEN, cout))
        wqkv = jnp.concatenate([pad_to(wq, (C_PAD, C_PAD)),
                                pad_to(wk, (C_PAD, C_PAD)),
                                pad_to(wv, (C_PAD, C_PAD))],
                               axis=1).astype(jnp.bfloat16)
        w1p = pad_to(w1, (C_PAD, FFN_HIDDEN)).astype(jnp.bfloat16)
        w2p = pad_to(w2, (FFN_HIDDEN, C_PAD)).astype(jnp.bfloat16)
        attn.append((wqkv, w1p, w2p, 1.0 / float(cin) ** 0.5))

    # Downsample score vectors (one per downsample layer), padded to C_PAD.
    ds_w = [pad_to(init((attn_cout[i],)), (C_PAD,)) for i in range(len(M_list))]

    # Res-link convs: Conv1d(ff_conv2_channels_out[l], 1024, 1, bias=False).
    conv_w = [pad_to(init((c, RES_CHANNELS)),
                     (C_PAD, RES_CHANNELS)).astype(jnp.bfloat16)
              for c in attn_cout]

    return {
        "edgeconv_K": edgeconv_K,
        "edgeconv_cout": edgeconv_cout,
        "edgeconv_w": edgeconv_w,
        "attn": attn,
        "ds_w": ds_w,
        "conv_w": conv_w,
        "M_list": M_list,
    }


if __name__ == "__main__":
    key = jax.random.PRNGKey(0)
    pkey, xkey = jax.random.split(key)
    params = init_params(pkey)

    B, C_in, N = 2, 3, 64
    x = jax.random.normal(xkey, (B, C_in, N), jnp.float32)            # (B, 3, N) point cloud

    out, res_link_list = feature_learning_block(params, x)
    out = jax.block_until_ready(out)
    for r in res_link_list:
        jax.block_until_ready(r)

    assert out.shape == (B, RES_CHANNELS * (1 + len(params["M_list"]))), out.shape
    assert all(r.shape == (B, RES_CHANNELS) for r in res_link_list)
    print("KERNEL_OK")
</pallas_src>

<mosaic_0001>
module attributes {stable_mosaic.version = 11 : i64} {
  func.func @_edgeconv_kernel(%arg0: i32, %arg1: memref<8x128x6xbf16, #tpu.memory_space<vmem>>, %arg2: memref<6x128xbf16, #tpu.memory_space<vmem>>, %arg3: memref<128x128xf32, #tpu.memory_space<vmem>>) attributes {dimension_semantics = [#tpu.dimension_semantics<parallel>], iteration_bounds = array<i64: 1>, scalar_prefetch = 0 : i64, scratch_operands = 0 : i64, tpu.core_type = #tpu.core_type<tc>, window_params = [{transform_indices = @transform_0, window_bounds = array<i64: 8, 128, 6>}, {pipeline_mode = #tpu.pipeline_mode<synchronous>, transform_indices = @transform_1, window_bounds = array<i64: 6, 128>}, {transform_indices = @transform_2, window_bounds = array<i64: 128, 128>}]} {
    %c0 = arith.constant 0 : index
    %c0_0 = arith.constant 0 : index
    %0 = vector.load %arg2[%c0, %c0_0] : memref<6x128xbf16, #tpu.memory_space<vmem>>, vector<6x128xbf16>
    %c0_1 = arith.constant 0 : index
    %c0_2 = arith.constant 0 : index
    %c0_3 = arith.constant 0 : index
    %1 = vector.load %arg1[%c0_1, %c0_2, %c0_3] : memref<8x128x6xbf16, #tpu.memory_space<vmem>>, vector<1x128x6xbf16>
    %2 = vector.shape_cast %1 : vector<1x128x6xbf16> to vector<128x6xbf16>
    %cst = arith.constant dense<0.000000e+00> : vector<128x128xf32>
    %3 = tpu.matmul %2, %0, %cst {dimension_numbers = #tpu.dot_dimension_numbers<[1], [0], [0], [1], [0, 0, 1, 1], [], []>} : vector<128x6xbf16>, vector<6x128xbf16>, vector<128x128xf32> -> vector<128x128xf32>
    %cst_4 = arith.constant 0.000000e+00 : f32
    %4 = vector.broadcast %cst_4 : f32 to vector<128x128xf32>
    %5 = arith.cmpf ogt, %3, %4 : vector<128x128xf32>
    %cst_5 = arith.constant 2.000000e-01 : f32
    %6 = vector.broadcast %cst_5 : f32 to vector<128x128xf32>
    %7 = arith.mulf %6, %3 : vector<128x128xf32>
    %8 = arith.select %5, %3, %7 : vector<128x128xi1>, vector<128x128xf32>
    %c1 = arith.constant 1 : index
    %c0_6 = arith.constant 0 : index
    %c0_7 = arith.constant 0 : index
    %9 = vector.load %arg1[%c1, %c0_6, %c0_7] : memref<8x128x6xbf16, #tpu.memory_space<vmem>>, vector<1x128x6xbf16>
    %10 = vector.shape_cast %9 : vector<1x128x6xbf16> to vector<128x6xbf16>
    %cst_8 = arith.constant dense<0.000000e+00> : vector<128x128xf32>
    %11 = tpu.matmul %10, %0, %cst_8 {dimension_numbers = #tpu.dot_dimension_numbers<[1], [0], [0], [1], [0, 0, 1, 1], [], []>} : vector<128x6xbf16>, vector<6x128xbf16>, vector<128x128xf32> -> vector<128x128xf32>
    %cst_9 = arith.constant 0.000000e+00 : f32
    %12 = vector.broadcast %cst_9 : f32 to vector<128x128xf32>
    %13 = arith.cmpf ogt, %11, %12 : vector<128x128xf32>
    %cst_10 = arith.constant 2.000000e-01 : f32
    %14 = vector.broadcast %cst_10 : f32 to vector<128x128xf32>
    %15 = arith.mulf %14, %11 : vector<128x128xf32>
    %16 = arith.select %13, %11, %15 : vector<128x128xi1>, vector<128x128xf32>
    %17 = arith.maximumf %8, %16 : vector<128x128xf32>
    %c2 = arith.constant 2 : index
    %c0_11 = arith.constant 0 : index
    %c0_12 = arith.constant 0 : index
    %18 = vector.load %arg1[%c2, %c0_11, %c0_12] : memref<8x128x6xbf16, #tpu.memory_space<vmem>>, vector<1x128x6xbf16>
    %19 = vector.shape_cast %18 : vector<1x128x6xbf16> to vector<128x6xbf16>
    %cst_13 = arith.constant dense<0.000000e+00> : vector<128x128xf32>
    %20 = tpu.matmul %19, %0, %cst_13 {dimension_numbers = #tpu.dot_dimension_numbers<[1], [0], [0], [1], [0, 0, 1, 1], [], []>} : vector<128x6xbf16>, vector<6x128xbf16>, vector<128x128xf32> -> vector<128x128xf32>
    %cst_14 = arith.constant 0.000000e+00 : f32
    %21 = vector.broadcast %cst_14 : f32 to vector<128x128xf32>
    %22 = arith.cmpf ogt, %20, %21 : vector<128x128xf32>
    %cst_15 = arith.constant 2.000000e-01 : f32
    %23 = vector.broadcast %cst_15 : f32 to vector<128x128xf32>
    %24 = arith.mulf %23, %20 : vector<128x128xf32>
    %25 = arith.select %22, %20, %24 : vector<128x128xi1>, vector<128x128xf32>
    %26 = arith.maximumf %17, %25 : vector<128x128xf32>
    %c3 = arith.constant 3 : index
    %c0_16 = arith.constant 0 : index
    %c0_17 = arith.constant 0 : index
    %27 = vector.load %arg1[%c3, %c0_16, %c0_17] : memref<8x128x6xbf16, #tpu.memory_space<vmem>>, vector<1x128x6xbf16>
    %28 = vector.shape_cast %27 : vector<1x128x6xbf16> to vector<128x6xbf16>
    %cst_18 = arith.constant dense<0.000000e+00> : vector<128x128xf32>
    %29 = tpu.matmul %28, %0, %cst_18 {dimension_numbers = #tpu.dot_dimension_numbers<[1], [0], [0], [1], [0, 0, 1, 1], [], []>} : vector<128x6xbf16>, vector<6x128xbf16>, vector<128x128xf32> -> vector<128x128xf32>
    %cst_19 = arith.constant 0.000000e+00 : f32
    %30 = vector.broadcast %cst_19 : f32 to vector<128x128xf32>
    %31 = arith.cmpf ogt, %29, %30 : vector<128x128xf32>
    %cst_20 = arith.constant 2.000000e-01 : f32
    %32 = vector.broadcast %cst_20 : f32 to vector<128x128xf32>
    %33 = arith.mulf %32, %29 : vector<128x128xf32>
    %34 = arith.select %31, %29, %33 : vector<128x128xi1>, vector<128x128xf32>
    %35 = arith.maximumf %26, %34 : vector<128x128xf32>
    %c4 = arith.constant 4 : index
    %c0_21 = arith.constant 0 : index
    %c0_22 = arith.constant 0 : index
    %36 = vector.load %arg1[%c4, %c0_21, %c0_22] : memref<8x128x6xbf16, #tpu.memory_space<vmem>>, vector<1x128x6xbf16>
    %37 = vector.shape_cast %36 : vector<1x128x6xbf16> to vector<128x6xbf16>
    %cst_23 = arith.constant dense<0.000000e+00> : vector<128x128xf32>
    %38 = tpu.matmul %37, %0, %cst_23 {dimension_numbers = #tpu.dot_dimension_numbers<[1], [0], [0], [1], [0, 0, 1, 1], [], []>} : vector<128x6xbf16>, vector<6x128xbf16>, vector<128x128xf32> -> vector<128x128xf32>
    %cst_24 = arith.constant 0.000000e+00 : f32
    %39 = vector.broadcast %cst_24 : f32 to vector<128x128xf32>
    %40 = arith.cmpf ogt, %38, %39 : vector<128x128xf32>
    %cst_25 = arith.constant 2.000000e-01 : f32
    %41 = vector.broadcast %cst_25 : f32 to vector<128x128xf32>
    %42 = arith.mulf %41, %38 : vector<128x128xf32>
    %43 = arith.select %40, %38, %42 : vector<128x128xi1>, vector<128x128xf32>
    %44 = arith.maximumf %35, %43 : vector<128x128xf32>
    %c5 = arith.constant 5 : index
    %c0_26 = arith.constant 0 : index
    %c0_27 = arith.constant 0 : index
    %45 = vector.load %arg1[%c5, %c0_26, %c0_27] : memref<8x128x6xbf16, #tpu.memory_space<vmem>>, vector<1x128x6xbf16>
    %46 = vector.shape_cast %45 : vector<1x128x6xbf16> to vector<128x6xbf16>
    %cst_28 = arith.constant dense<0.000000e+00> : vector<128x128xf32>
    %47 = tpu.matmul %46, %0, %cst_28 {dimension_numbers = #tpu.dot_dimension_numbers<[1], [0], [0], [1], [0, 0, 1, 1], [], []>} : vector<128x6xbf16>, vector<6x128xbf16>, vector<128x128xf32> -> vector<128x128xf32>
    %cst_29 = arith.constant 0.000000e+00 : f32
    %48 = vector.broadcast %cst_29 : f32 to vector<128x128xf32>
    %49 = arith.cmpf ogt, %47, %48 : vector<128x128xf32>
    %cst_30 = arith.constant 2.000000e-01 : f32
    %50 = vector.broadcast %cst_30 : f32 to vector<128x128xf32>
    %51 = arith.mulf %50, %47 : vector<128x128xf32>
    %52 = arith.select %49, %47, %51 : vector<128x128xi1>, vector<128x128xf32>
    %53 = arith.maximumf %44, %52 : vector<128x128xf32>
    %c6 = arith.constant 6 : index
    %c0_31 = arith.constant 0 : index
    %c0_32 = arith.constant 0 : index
    %54 = vector.load %arg1[%c6, %c0_31, %c0_32] : memref<8x128x6xbf16, #tpu.memory_space<vmem>>, vector<1x128x6xbf16>
    %55 = vector.shape_cast %54 : vector<1x128x6xbf16> to vector<128x6xbf16>
    %cst_33 = arith.constant dense<0.000000e+00> : vector<128x128xf32>
    %56 = tpu.matmul %55, %0, %cst_33 {dimension_numbers = #tpu.dot_dimension_numbers<[1], [0], [0], [1], [0, 0, 1, 1], [], []>} : vector<128x6xbf16>, vector<6x128xbf16>, vector<128x128xf32> -> vector<128x128xf32>
    %cst_34 = arith.constant 0.000000e+00 : f32
    %57 = vector.broadcast %cst_34 : f32 to vector<128x128xf32>
    %58 = arith.cmpf ogt, %56, %57 : vector<128x128xf32>
    %cst_35 = arith.constant 2.000000e-01 : f32
    %59 = vector.broadcast %cst_35 : f32 to vector<128x128xf32>
    %60 = arith.mulf %59, %56 : vector<128x128xf32>
    %61 = arith.select %58, %56, %60 : vector<128x128xi1>, vector<128x128xf32>
    %62 = arith.maximumf %53, %61 : vector<128x128xf32>
    %c7 = arith.constant 7 : index
    %c0_36 = arith.constant 0 : index
    %c0_37 = arith.constant 0 : index
    %63 = vector.load %arg1[%c7, %c0_36, %c0_37] : memref<8x128x6xbf16, #tpu.memory_space<vmem>>, vector<1x128x6xbf16>
    %64 = vector.shape_cast %63 : vector<1x128x6xbf16> to vector<128x6xbf16>
    %cst_38 = arith.constant dense<0.000000e+00> : vector<128x128xf32>
    %65 = tpu.matmul %64, %0, %cst_38 {dimension_numbers = #tpu.dot_dimension_numbers<[1], [0], [0], [1], [0, 0, 1, 1], [], []>} : vector<128x6xbf16>, vector<6x128xbf16>, vector<128x128xf32> -> vector<128x128xf32>
    %cst_39 = arith.constant 0.000000e+00 : f32
    %66 = vector.broadcast %cst_39 : f32 to vector<128x128xf32>
    %67 = arith.cmpf ogt, %65, %66 : vector<128x128xf32>
    %cst_40 = arith.constant 2.000000e-01 : f32
    %68 = vector.broadcast %cst_40 : f32 to vector<128x128xf32>
    %69 = arith.mulf %68, %65 : vector<128x128xf32>
    %70 = arith.select %67, %65, %69 : vector<128x128xi1>, vector<128x128xf32>
    %71 = arith.maximumf %62, %70 : vector<128x128xf32>
    %c0_41 = arith.constant 0 : index
    %c0_42 = arith.constant 0 : index
    %72 = vector.load %arg3[%c0_41, %c0_42] : memref<128x128xf32, #tpu.memory_space<vmem>>, vector<128x128xf32>
    tpu.vector_store %arg3[%c0_41, %c0_42], %71 {strides = array<i32>} : memref<128x128xf32, #tpu.memory_space<vmem>>, vector<128x128xf32>,
    return
  }
  func.func @transform_0(%arg0: i32) -> (i32, i32, i32) {
    %c0_i32 = arith.constant 0 : i32
    %c0_i32_0 = arith.constant 0 : i32
    %c0_i32_1 = arith.constant 0 : i32
    return %c0_i32, %arg0, %c0_i32_0 : i32, i32, i32
  }
  func.func @transform_1(%arg0: i32) -> (i32, i32) {
    %c0_i32 = arith.constant 0 : i32
    %c0_i32_0 = arith.constant 0 : i32
    %c0_i32_1 = arith.constant 0 : i32
    return %c0_i32, %c0_i32_0 : i32, i32
  }
  func.func @transform_2(%arg0: i32) -> (i32, i32) {
    %c0_i32 = arith.constant 0 : i32
    %c0_i32_0 = arith.constant 0 : i32
    return %arg0, %c0_i32 : i32, i32
  }
}

</mosaic_0001>

<bundles_post_ra>
// kernel: tpu_custom_call.1
= control target key start
LH: loop header
LB: loop body
LE: loop exit
PB: predicated region body
PF: predicated region fallthrough
CT: control target
= control target key end

     0   :  { %vm95_vm0 = vcmask 1042432   ;;  %vm70_vm1 = vcmask 48128   ;;  %s3276_s0 = inlined_call_operand.vmem [shape: bf16[8,128,6], index: 0, kind: input, shape index: {}]   ;;  %s3277_s1 = inlined_call_operand.vmem [shape: bf16[6,128], index: 1, kind: input, shape index: {}]   ;;  %s3278_s2 = inlined_call_operand.hbm [shape: f32[128,128], index: 2, kind: output, shape index: {}]  }
   0x1   :  { %v2546_v0 = vld [vmem:[%s3277_s1] sm:$0x7]  ;;  %v2439_v4 = vld [vmem:[%s3276_s0 + $0x8] sm:$0xff]   ;;  %v2441_v6 = vld [vmem:[%s3276_s0 + $0x10] sm:$0xff]  }
   0x2   :  { %v2437_v1 = vld [vmem:[%s3276_s0] sm:$0xff]   ;;  %2426 = vmatprep.subr.msk.bf16.mxu0 %vm95_vm0, %v2546_v0  ;;  %2427 = vmatprep.subr.msk.bf16.mxu1 %vm95_vm0, %v2546_v0  ;;  %v2557_v2 = vsel %vm95_vm0, %v2546_v0, 0  ;;  %v2440_v5 = vld [vmem:[%s3276_s0 + $0x48] sm:$0xff]   ;;  %v2442_v7 = vld [vmem:[%s3276_s0 + $0x50] sm:$0xff]  }
   0x3   :  { %2283 = vmatpush3.bf16.msra.mxu0 %v2557_v2  ;;  %2301 = vmatpush3.bf16.msra.mxu1 %v2557_v2  ;;  %v2438_v3 = vld [vmem:[%s3276_s0 + $0x40] sm:$0xff]   ;;  %v2443_v8 = vld [vmem:[%s3276_s0 + $0x18] sm:$0xff]   ;;  %v2447_v12 = vld [vmem:[%s3276_s0 + $0x28] sm:$0xff]  }
   0x4   :  { %2284 = vmatprep.mubr.msk.bf16.mxu0 %vm70_vm1, %v2437_v1  ;;  %2428 = vmatprep.subr.msk.bf16.mxu0 %vm95_vm0, %v2546_v0  ;;  %v2444_v9 = vld [vmem:[%s3276_s0 + $0x58] sm:$0xff]   ;;  %v2445_v10 = vld [vmem:[%s3276_s0 + $0x20] sm:$0xff]   ;;  %v2448_v13 = vld [vmem:[%s3276_s0 + $0x68] sm:$0xff]  }
   0x5   :  { %2302 = vmatprep.mubr.msk.bf16.mxu1 %vm70_vm1, %v2438_v3  ;;  %2429 = vmatprep.subr.msk.bf16.mxu1 %vm95_vm0, %v2546_v0  ;;  %v2446_v11 = vld [vmem:[%s3276_s0 + $0x60] sm:$0xff]   ;;  %v2449_v14 = vld [vmem:[%s3276_s0 + $0x30] sm:$0xff]   ;;  %v2451_v16 = vld [vmem:[%s3276_s0 + $0x38] sm:$0xff]  }
   0x6   :  { %2285 = vmatmul.mubr.msk.bf16.vlgmr.msra.gmra.mrb[0].mxu0 %vm70_vm1, %v2439_v4  ;;  %2303 = vmatmul.mubr.msk.bf16.vlgmr.msra.gmra.mrb[0].mxu1 %vm70_vm1, %v2440_v5  ;;  %v2450_v15 = vld [vmem:[%s3276_s0 + $0x70] sm:$0xff]   ;;  %v2452_v17 = vld [vmem:[%s3276_s0 + $0x78] sm:$0xff]   ;;  %v2453_v18 = vld [vmem:[%s3276_s0 + $0x80] sm:$0xff]  }
   0x7   :  { %2319 = vmatpush3.bf16.msra.mxu0 %v2557_v2  ;;  %2337 = vmatpush3.bf16.msra.mxu1 %v2557_v2  ;;  %v2454_v19 = vld [vmem:[%s3276_s0 + $0xc0] sm:$0xff]   ;;  %v2455_v20 = vld [vmem:[%s3276_s0 + $0x88] sm:$0xff]   ;;  %v2457_v22 = vld [vmem:[%s3276_s0 + $0x90] sm:$0xff]  }
   0x8   :  { %2288 = vmatprep.mubr.msk.bf16.mxu0 %vm70_vm1, %v2441_v6  ;;  %2306 = vmatprep.mubr.msk.bf16.mxu1 %vm70_vm1, %v2442_v7  ;;  %v2456_v21 = vld [vmem:[%s3276_s0 + $0xc8] sm:$0xff]   ;;  %v2458_v23 = vld [vmem:[%s3276_s0 + $0xd0] sm:$0xff]   ;;  %v2459_v24 = vld [vmem:[%s3276_s0 + $0x98] sm:$0xff]  }
   0x9   :  { %2430 = vmatprep.subr.msk.bf16.mxu0 %vm95_vm0, %v2546_v0  ;;  %2431 = vmatprep.subr.msk.bf16.mxu1 %vm95_vm0, %v2546_v0  ;;  %v2460_v25 = vld [vmem:[%s3276_s0 + $0xd8] sm:$0xff]   ;;  %v2461_v26 = vld [vmem:[%s3276_s0 + $0xa0] sm:$0xff]   ;;  %v2463_v28 = vld [vmem:[%s3276_s0 + $0xa8] sm:$0xff]  }
   0xa   :  { %v2462_v27 = vld [vmem:[%s3276_s0 + $0xe0] sm:$0xff]   ;;  %v2464_v29 = vld [vmem:[%s3276_s0 + $0xe8] sm:$0xff]   ;;  %v2465_v30 = vld [vmem:[%s3276_s0 + $0xb0] sm:$0xff]  }
   0xb   :  { %v2466_v31 = vld [vmem:[%s3276_s0 + $0xf0] sm:$0xff]   ;;  %v2467_v32 = vld [vmem:[%s3276_s0 + $0xb8] sm:$0xff]   ;;  %v2469_v34 = vld [vmem:[%s3276_s0 + $0x100] sm:$0xff]  }
   0xc   :  { %v2468_v33 = vld [vmem:[%s3276_s0 + $0xf8] sm:$0xff]   ;;  %v2470_v35 = vld [vmem:[%s3276_s0 + $0x140] sm:$0xff]  }
   0xe   :  { %2289 = vmatmul.mubr.msk.bf16.gmra.mrb[4].mxu0 %vm70_vm1, %v2443_v8  ;;  %2307 = vmatmul.mubr.msk.bf16.gmra.mrb[4].mxu1 %vm70_vm1, %v2444_v9 }
   0xf   :  { %2292 = vmatprep.mubr.msk.bf16.mxu0 %vm70_vm1, %v2445_v10  ;;  %2310 = vmatprep.mubr.msk.bf16.mxu1 %vm70_vm1, %v2446_v11 }
  0x16   :  { %2293 = vmatmul.mubr.msk.bf16.gmra.mrb[8].mxu0 %vm70_vm1, %v2447_v12  ;;  %2311 = vmatmul.mubr.msk.bf16.gmra.mrb[8].mxu1 %vm70_vm1, %v2448_v13 }
  0x17   :  { %2296 = vmatprep.mubr.msk.bf16.mxu0 %vm70_vm1, %v2449_v14  ;;  %2314 = vmatprep.mubr.msk.bf16.mxu1 %vm70_vm1, %v2450_v15 }
  0x1e   :  { %2297 = vmatmul.mubr.msk.bf16.gmra.mrb[12].mxu0 %vm70_vm1, %v2451_v16  ;;  %2315 = vmatmul.mubr.msk.bf16.gmra.mrb[12].mxu1 %vm70_vm1, %v2452_v17 }
  0x1f   :  { %2320 = vmatprep.mubr.msk.bf16.mxu0 %vm70_vm1, %v2453_v18  ;;  %2338 = vmatprep.mubr.msk.bf16.mxu1 %vm70_vm1, %v2454_v19 }
  0x26   :  { %2321 = vmatmul.mubr.msk.bf16.vlgmr.msra.gmra.mrb[16].mxu0 %vm70_vm1, %v2455_v20  ;;  %2339 = vmatmul.mubr.msk.bf16.vlgmr.msra.gmra.mrb[16].mxu1 %vm70_vm1, %v2456_v21 }
  0x27   :  { %2355 = vmatpush3.bf16.msra.mxu0 %v2557_v2  ;;  %2373 = vmatpush3.bf16.msra.mxu1 %v2557_v2 }
  0x28   :  { %2324 = vmatprep.mubr.msk.bf16.mxu0 %vm70_vm1, %v2457_v22  ;;  %2342 = vmatprep.mubr.msk.bf16.mxu1 %vm70_vm1, %v2458_v23 }
  0x29   :  { %2432 = vmatprep.subr.msk.bf16.mxu0 %vm95_vm0, %v2546_v0  ;;  %2433 = vmatprep.subr.msk.bf16.mxu1 %vm95_vm0, %v2546_v0 }
  0x2e   :  { %2325 = vmatmul.mubr.msk.bf16.gmra.mrb[20].mxu0 %vm70_vm1, %v2459_v24  ;;  %2343 = vmatmul.mubr.msk.bf16.gmra.mrb[20].mxu1 %vm70_vm1, %v2460_v25 }
  0x2f   :  { %2328 = vmatprep.mubr.msk.bf16.mxu0 %vm70_vm1, %v2461_v26  ;;  %2346 = vmatprep.mubr.msk.bf16.mxu1 %vm70_vm1, %v2462_v27 }
  0x36   :  { %2329 = vmatmul.mubr.msk.bf16.gmra.mrb[24].mxu0 %vm70_vm1, %v2463_v28  ;;  %2347 = vmatmul.mubr.msk.bf16.gmra.mrb[24].mxu1 %vm70_vm1, %v2464_v29 }
  0x37   :  { %2332 = vmatprep.mubr.msk.bf16.mxu0 %vm70_vm1, %v2465_v30  ;;  %2350 = vmatprep.mubr.msk.bf16.mxu1 %vm70_vm1, %v2466_v31 }
  0x3e   :  { %2333 = vmatmul.mubr.msk.bf16.gmra.mrb[28].mxu0 %vm70_vm1, %v2467_v32  ;;  %2351 = vmatmul.mubr.msk.bf16.gmra.mrb[28].mxu1 %vm70_vm1, %v2468_v33 }
  0x3f   :  { %2356 = vmatprep.mubr.msk.bf16.mxu0 %vm70_vm1, %v2469_v34  ;;  %2374 = vmatprep.mubr.msk.bf16.mxu1 %vm70_vm1, %v2470_v35 }
  0x40   :  { %7 = vsyncpa [#allocation3], 0  ;;  %v2471_v36 = vld [vmem:[%s3276_s0 + $0x108] sm:$0xff]   ;;  %v2473_v38 = vld [vmem:[%s3276_s0 + $0x110] sm:$0xff]  }
  0x41   :  { %v2472_v37 = vld [vmem:[%s3276_s0 + $0x148] sm:$0xff]   ;;  %v2474_v39 = vld [vmem:[%s3276_s0 + $0x150] sm:$0xff]   ;;  %v2475_v40 = vld [vmem:[%s3276_s0 + $0x118] sm:$0xff]  }
  0x42   :  { %v2476_v41 = vld [vmem:[%s3276_s0 + $0x158] sm:$0xff]   ;;  %v2477_v42 = vld [vmem:[%s3276_s0 + $0x120] sm:$0xff]   ;;  %v2479_v44 = vld [vmem:[%s3276_s0 + $0x128] sm:$0xff]  }
  0x43   :  { %v2478_v43 = vld [vmem:[%s3276_s0 + $0x160] sm:$0xff]   ;;  %v2480_v45 = vld [vmem:[%s3276_s0 + $0x168] sm:$0xff]   ;;  %v2481_v46 = vld [vmem:[%s3276_s0 + $0x130] sm:$0xff]  }
  0x44   :  { %v2482_v47 = vld [vmem:[%s3276_s0 + $0x170] sm:$0xff]   ;;  %v2483_v48 = vld [vmem:[%s3276_s0 + $0x138] sm:$0xff]   ;;  %v2485_v50 = vld [vmem:[%s3276_s0 + $0x180] sm:$0xff]  }
  0x45   :  { %v2484_v49 = vld [vmem:[%s3276_s0 + $0x178] sm:$0xff]   ;;  %v2486_v51 = vld [vmem:[%s3276_s0 + $0x1c0] sm:$0xff]   ;;  %v2487_v52 = vld [vmem:[%s3276_s0 + $0x188] sm:$0xff]  }
  0x46   :  { %2357 = vmatmul.mubr.msk.bf16.vlgmr.msra.gmra.mrb[32].mxu0 %vm70_vm1, %v2471_v36  ;;  %2375 = vmatmul.mubr.msk.bf16.vlgmr.msra.gmra.mrb[32].mxu1 %vm70_vm1, %v2472_v37  ;;  %v2488_v53 = vld [vmem:[%s3276_s0 + $0x1c8] sm:$0xff]   ;;  %v2489_v54 = vld [vmem:[%s3276_s0 + $0x190] sm:$0xff]   ;;  %v2491_v56 = vld [vmem:[%s3276_s0 + $0x198] sm:$0xff]  }
  0x47   :  { %2391 = vmatpush3.bf16.msra.mxu0 %v2557_v2  ;;  %2409 = vmatpush3.bf16.msra.mxu1 %v2557_v2  ;;  %v2490_v55 = vld [vmem:[%s3276_s0 + $0x1d0] sm:$0xff]   ;;  %v2492_v57 = vld [vmem:[%s3276_s0 + $0x1d8] sm:$0xff]   ;;  %v2493_v58 = vld [vmem:[%s3276_s0 + $0x1a0] sm:$0xff]  }
  0x48   :  { %2360 = vmatprep.mubr.msk.bf16.mxu0 %vm70_vm1, %v2473_v38  ;;  %2378 = vmatprep.mubr.msk.bf16.mxu1 %vm70_vm1, %v2474_v39  ;;  %v2494_v59 = vld [vmem:[%s3276_s0 + $0x1e0] sm:$0xff]   ;;  %v2495_v60 = vld [vmem:[%s3276_s0 + $0x1a8] sm:$0xff]   ;;  %v2497_v62 = vld [vmem:[%s3276_s0 + $0x1b0] sm:$0xff]  }
  0x49   :  { %v2496_v61 = vld [vmem:[%s3276_s0 + $0x1e8] sm:$0xff]   ;;  %v2498_v63 = vld [vmem:[%s3276_s0 + $0x1f0] sm:$0xff]   ;;  %v2499_v0 = vld [vmem:[%s3276_s0 + $0x1b8] sm:$0xff]  }
  0x4a   :  { %v2500_v1 = vld [vmem:[%s3276_s0 + $0x1f8] sm:$0xff]   ;;  %s2525_s0 = smov [#allocation2]  }
  0x4b   :  { %s1959_s22 = sshll.u32 %s2525_s0, 4  ;;  %s1960_s22 = int_to_ptr.vmem [resolvable:$true] %s1959_s22 }
  0x4c   :  { %s2501_s23 = scalar_lea.vmem %s1960_s22, 2048  ;;  %p2506_p1 = scmp.lt.s32.totalorder %s1960_s22, %s1960_s22 }
  0x4d   :  { %p2502_p0 = scmp.ne.s32.totalorder %s1960_s22, %s2501_s23  ;;  %p2507_p2 = scmp.lt.s32.totalorder %s2501_s23, %s2501_s23 }
  0x4e   :  { %2361 = vmatmul.mubr.msk.bf16.gmra.mrb[36].mxu0 %vm70_vm1, %v2475_v40  ;;  %2379 = vmatmul.mubr.msk.bf16.gmra.mrb[36].mxu1 %vm70_vm1, %v2476_v41 }
  0x4f   :  { %2364 = vmatprep.mubr.msk.bf16.mxu0 %vm70_vm1, %v2477_v42  ;;  %2382 = vmatprep.mubr.msk.bf16.mxu1 %vm70_vm1, %v2478_v43  ;;  %p2508_p3 = por %p2507_p2, %p2506_p1 }
  0x51   :  { %p2509_p4 = pnand %p2508_p3, %p2502_p0 }
  0x56   :  { %2365 = vmatmul.mubr.msk.bf16.gmra.mrb[40].mxu0 %vm70_vm1, %v2479_v44  ;;  %2383 = vmatmul.mubr.msk.bf16.gmra.mrb[40].mxu1 %vm70_vm1, %v2480_v45 }
  0x57   :  { %2368 = vmatprep.mubr.msk.bf16.mxu0 %vm70_vm1, %v2481_v46  ;;  %2386 = vmatprep.mubr.msk.bf16.mxu1 %vm70_vm1, %v2482_v47 }
  0x5e   :  { %2369 = vmatmul.mubr.msk.bf16.gmra.mrb[44].mxu0 %vm70_vm1, %v2483_v48  ;;  %2387 = vmatmul.mubr.msk.bf16.gmra.mrb[44].mxu1 %vm70_vm1, %v2484_v49 }
  0x5f   :  { %2392 = vmatprep.mubr.msk.bf16.mxu0 %vm70_vm1, %v2485_v50  ;;  %2410 = vmatprep.mubr.msk.bf16.mxu1 %vm70_vm1, %v2486_v51 }
  0x66   :  { %2393 = vmatmul.mubr.msk.bf16.vlgmr.msra.gmra.mrb[48].mxu0 %vm70_vm1, %v2487_v52  ;;  %2411 = vmatmul.mubr.msk.bf16.vlgmr.msra.gmra.mrb[48].mxu1 %vm70_vm1, %v2488_v53 }
  0x67   :  { %2396 = vmatprep.mubr.msk.bf16.mxu0 %vm70_vm1, %v2489_v54  ;;  %2414 = vmatprep.mubr.msk.bf16.mxu1 %vm70_vm1, %v2490_v55 }
  0x6e   :  { %2397 = vmatmul.mubr.msk.bf16.gmra.mrb[52].mxu0 %vm70_vm1, %v2491_v56  ;;  %2415 = vmatmul.mubr.msk.bf16.gmra.mrb[52].mxu1 %vm70_vm1, %v2492_v57 }
  0x6f   :  { %2400 = vmatprep.mubr.msk.bf16.mxu0 %vm70_vm1, %v2493_v58  ;;  %2418 = vmatprep.mubr.msk.bf16.mxu1 %vm70_vm1, %v2494_v59 }
  0x76   :  { %2401 = vmatmul.mubr.msk.bf16.gmra.mrb[56].mxu0 %vm70_vm1, %v2495_v60  ;;  %2419 = vmatmul.mubr.msk.bf16.gmra.mrb[56].mxu1 %vm70_vm1, %v2496_v61 }
  0x77   :  { %2404 = vmatprep.mubr.msk.bf16.mxu0 %vm70_vm1, %v2497_v62  ;;  %2422 = vmatprep.mubr.msk.bf16.mxu1 %vm70_vm1, %v2498_v63 }
  0x7e   :  { %2405 = vmatmul.mubr.msk.bf16.gmra.mrb[60].mxu0 %vm70_vm1, %v2499_v0  ;;  %2423 = vmatmul.mubr.msk.bf16.gmra.mrb[60].mxu1 %vm70_vm1, %v2500_v1 }
  0xd9   :  { %v2286_v2 = vpop.f32.mrb[0].mxu0  ;;  %v2304_v4 = vpop.f32.mrb[0].mxu1 }
  0xda   :  { %vm198_vm2 = vcmp.gt.f32.partialorder %v2286_v2, 0.0  ;;  %v214_v3 = vmul.f32 0.2, %v2286_v2  ;;  %v133_v5 = vpop.f32.mrb[1].mxu0  ;;  %vm424_vm3 = vcmp.gt.f32.partialorder %v2304_v4, 0.0  ;;  %v359_v9 = vpop.f32.mrb[1].mxu1 }
  0xdb   :  { %v440_v6 = vmul.f32 0.2, %v2304_v4  ;;  %vm196_vm4 = vcmp.gt.f32.partialorder %v133_v5, 0.0  ;;  %v212_v7 = vmul.f32 0.2, %v133_v5  ;;  %v2287_v10 = vpop.f32.mrb[2].mxu0 }
  0xdc   :  { %v2832_v8 = vsel %vm198_vm2, %v2286_v2, %v214_v3  ;;  %vm422_vm5 = vcmp.gt.f32.partialorder %v359_v9, 0.0  ;;  %v438_v13 = vmul.f32 0.2, %v359_v9  ;;  %v2305_v14 = vpop.f32.mrb[2].mxu1  ;;  %v136_v15 = vpop.f32.mrb[3].mxu0  ;;  %vm199_vm6 = vcmp.gt.f32.partialorder %v2287_v10, 0.0 }
  0xdd   :  { %v2834_v11 = vsel %vm424_vm3, %v2304_v4, %v440_v6  ;;  %v2836_v12 = vsel %vm196_vm4, %v133_v5, %v212_v7  ;;  %v215_v17 = vmul.f32 0.2, %v2287_v10  ;;  %vm425_vm7 = vcmp.gt.f32.partialorder %v2305_v14, 0.0  ;;  %v362_v18 = vpop.f32.mrb[3].mxu1 }
  0xde   :  { %v472_v16 = vmax.f32 %v2832_v8, %v2834_v11  ;;  %v2840_v19 = vsel %vm422_vm5, %v359_v9, %v438_v13  ;;  %v441_v20 = vmul.f32 0.2, %v2305_v14  ;;  %vm197_vm8 = vcmp.gt.f32.partialorder %v136_v15, 0.0 }
  0xdf   :  { %v213_v21 = vmul.f32 0.2, %v136_v15  ;;  %v470_v22 = vmax.f32 %v2836_v12, %v2840_v19  ;;  %v2844_v23 = vsel %vm199_vm6, %v2287_v10, %v215_v17  ;;  %vm423_vm9 = vcmp.gt.f32.partialorder %v362_v18, 0.0 }
  0xe0   :  { %v439_v24 = vmul.f32 0.2, %v362_v18  ;;  %v2846_v25 = vsel %vm425_vm7, %v2305_v14, %v441_v20 }
  0xe1   :  { %v2848_v26 = vsel %vm197_vm8, %v136_v15, %v213_v21  ;;  %v2290_v27 = vpop.f32.mrb[4].mxu0  ;;  %v473_v28 = vmax.f32 %v2844_v23, %v2846_v25  ;;  %v2308_v31 = vpop.f32.mrb[4].mxu1 }
  0xe2   :  { %v2852_v29 = vsel %vm423_vm9, %v362_v18, %v439_v24  ;;  %vm202_vm10 = vcmp.gt.f32.partialorder %v2290_v27, 0.0  ;;  %v218_v30 = vmul.f32 0.2, %v2290_v27  ;;  %v149_v32 = vpop.f32.mrb[5].mxu0  ;;  %vm428_vm11 = vcmp.gt.f32.partialorder %v2308_v31, 0.0  ;;  %v375_v35 = vpop.f32.mrb[5].mxu1 }
  0xe3   :  { %v471_v33 = vmax.f32 %v2848_v26, %v2852_v29  ;;  %v444_v34 = vmul.f32 0.2, %v2308_v31  ;;  %vm200_vm12 = vcmp.gt.f32.partialorder %v149_v32, 0.0  ;;  %v2291_v36 = vpop.f32.mrb[6].mxu0  ;;  %v216_v38 = vmul.f32 0.2, %v149_v32 }
  0xe4   :  { %v2856_v37 = vsel %vm202_vm10, %v2290_v27, %v218_v30  ;;  %vm426_vm13 = vcmp.gt.f32.partialorder %v375_v35, 0.0  ;;  %v442_v39 = vmul.f32 0.2, %v375_v35  ;;  %v2309_v40 = vpop.f32.mrb[6].mxu1  ;;  %vm203_vm14 = vcmp.gt.f32.partialorder %v2291_v36, 0.0  ;;  %v152_v43 = vpop.f32.mrb[7].mxu0 }
  0xe5   :  { %v2858_v41 = vsel %vm428_vm11, %v2308_v31, %v444_v34  ;;  %v219_v42 = vmul.f32 0.2, %v2291_v36  ;;  %vm429_vm15 = vcmp.gt.f32.partialorder %v2309_v40, 0.0  ;;  %v378_v44 = vpop.f32.mrb[7].mxu1  ;;  %v2862_v46 = vsel %vm200_vm12, %v149_v32, %v216_v38 }
  0xe6   :  { %v476_v45 = vmax.f32 %v2856_v37, %v2858_v41  ;;  %v2864_v47 = vsel %vm426_vm13, %v375_v35, %v442_v39  ;;  %v445_v48 = vmul.f32 0.2, %v2309_v40  ;;  %vm201_vm0 = vcmp.gt.f32.partialorder %v152_v43, 0.0 }
  0xe7   :  { %v474_v49 = vmax.f32 %v2862_v46, %v2864_v47  ;;  %v2868_v50 = vsel %vm203_vm14, %v2291_v36, %v219_v42  ;;  %v217_v51 = vmul.f32 0.2, %v152_v43  ;;  %vm427_vm1 = vcmp.gt.f32.partialorder %v378_v44, 0.0 }
  0xe8   :  { %v2870_v52 = vsel %vm429_vm15, %v2309_v40, %v445_v48  ;;  %v443_v53 = vmul.f32 0.2, %v378_v44 }
  0xe9   :  { %v477_v54 = vmax.f32 %v2868_v50, %v2870_v52  ;;  %v2874_v55 = vsel %vm201_vm0, %v152_v43, %v217_v51  ;;  %v2294_v56 = vpop.f32.mrb[8].mxu0  ;;  %v2312_v59 = vpop.f32.mrb[8].mxu1 }
  0xea   :  { %v2876_v57 = vsel %vm427_vm1, %v378_v44, %v443_v53  ;;  %vm206_vm2 = vcmp.gt.f32.partialorder %v2294_v56, 0.0  ;;  %v222_v58 = vmul.f32 0.2, %v2294_v56  ;;  %v165_v60 = vpop.f32.mrb[9].mxu0  ;;  %vm432_vm3 = vcmp.gt.f32.partialorder %v2312_v59, 0.0  ;;  %v391_v63 = vpop.f32.mrb[9].mxu1 }
  0xeb   :  { %v475_v61 = vmax.f32 %v2874_v55, %v2876_v57  ;;  %v448_v62 = vmul.f32 0.2, %v2312_v59  ;;  %vm204_vm4 = vcmp.gt.f32.partialorder %v165_v60, 0.0  ;;  %v2295_v0 = vpop.f32.mrb[10].mxu0  ;;  %v220_v2 = vmul.f32 0.2, %v165_v60 }
  0xec   :  { %v2880_v1 = vsel %vm206_vm2, %v2294_v56, %v222_v58  ;;  %vm430_vm5 = vcmp.gt.f32.partialorder %v391_v63, 0.0  ;;  %v446_v3 = vmul.f32 0.2, %v391_v63  ;;  %v2313_v4 = vpop.f32.mrb[10].mxu1  ;;  %vm207_vm6 = vcmp.gt.f32.partialorder %v2295_v0, 0.0  ;;  %v168_v7 = vpop.f32.mrb[11].mxu0 }
  0xed   :  { %v2882_v5 = vsel %vm432_vm3, %v2312_v59, %v448_v62  ;;  %v223_v6 = vmul.f32 0.2, %v2295_v0  ;;  %vm433_vm7 = vcmp.gt.f32.partialorder %v2313_v4, 0.0  ;;  %v394_v9 = vpop.f32.mrb[11].mxu1  ;;  %v2886_v13 = vsel %vm204_vm4, %v165_v60, %v220_v2 }
  0xee   :  { %v480_v10 = vmax.f32 %v2880_v1, %v2882_v5  ;;  %v2888_v14 = vsel %vm430_vm5, %v391_v63, %v446_v3  ;;  %v449_v15 = vmul.f32 0.2, %v2313_v4  ;;  %vm205_vm8 = vcmp.gt.f32.partialorder %v168_v7, 0.0 }
  0xef   :  { %v478_v17 = vmax.f32 %v2886_v13, %v2888_v14  ;;  %v2892_v18 = vsel %vm207_vm6, %v2295_v0, %v223_v6  ;;  %v221_v20 = vmul.f32 0.2, %v168_v7  ;;  %vm431_vm9 = vcmp.gt.f32.partialorder %v394_v9, 0.0 }
  0xf0   :  { %v2894_v21 = vsel %vm433_vm7, %v2313_v4, %v449_v15  ;;  %v447_v24 = vmul.f32 0.2, %v394_v9 }
  0xf1   :  { %v481_v27 = vmax.f32 %v2892_v18, %v2894_v21  ;;  %v2898_v30 = vsel %vm205_vm8, %v168_v7, %v221_v20  ;;  %v2298_v31 = vpop.f32.mrb[12].mxu0  ;;  %v2316_v35 = vpop.f32.mrb[12].mxu1 }
  0xf2   :  { %v2900_v32 = vsel %vm431_vm9, %v394_v9, %v447_v24  ;;  %vm210_vm10 = vcmp.gt.f32.partialorder %v2298_v31, 0.0  ;;  %v226_v34 = vmul.f32 0.2, %v2298_v31  ;;  %v181_v36 = vpop.f32.mrb[13].mxu0  ;;  %vm436_vm11 = vcmp.gt.f32.partialorder %v2316_v35, 0.0  ;;  %v407_v40 = vpop.f32.mrb[13].mxu1 }
  0xf3   :  { %v479_v38 = vmax.f32 %v2898_v30, %v2900_v32  ;;  %v452_v39 = vmul.f32 0.2, %v2316_v35  ;;  %vm208_vm12 = vcmp.gt.f32.partialorder %v181_v36, 0.0  ;;  %v2299_v42 = vpop.f32.mrb[14].mxu0  ;;  %v224_v44 = vmul.f32 0.2, %v181_v36 }
  0xf4   :  { %v2904_v43 = vsel %vm210_vm10, %v2298_v31, %v226_v34  ;;  %vm434_vm13 = vcmp.gt.f32.partialorder %v407_v40, 0.0  ;;  %v450_v48 = vmul.f32 0.2, %v407_v40  ;;  %v2317_v51 = vpop.f32.mrb[14].mxu1  ;;  %vm211_vm14 = vcmp.gt.f32.partialorder %v2299_v42, 0.0  ;;  %v184_v58 = vpop.f32.mrb[15].mxu0 }
  0xf5   :  { %v2906_v53 = vsel %vm436_vm11, %v2316_v35, %v452_v39  ;;  %v227_v56 = vmul.f32 0.2, %v2299_v42  ;;  %vm437_vm15 = vcmp.gt.f32.partialorder %v2317_v51, 0.0  ;;  %v410_v59 = vpop.f32.mrb[15].mxu1  ;;  %v2910_v62 = vsel %vm208_vm12, %v181_v36, %v224_v44 }
  0xf6   :  { %v484_v60 = vmax.f32 %v2904_v43, %v2906_v53  ;;  %v2912_v63 = vsel %vm434_vm13, %v407_v40, %v450_v48  ;;  %v453_v0 = vmul.f32 0.2, %v2317_v51  ;;  %vm209_vm0 = vcmp.gt.f32.partialorder %v184_v58, 0.0 }
  0xf7   :  { %v482_v2 = vmax.f32 %v2910_v62, %v2912_v63  ;;  %v2916_v3 = vsel %vm211_vm14, %v2299_v42, %v227_v56  ;;  %v225_v4 = vmul.f32 0.2, %v184_v58  ;;  %vm435_vm1 = vcmp.gt.f32.partialorder %v410_v59, 0.0 }
  0xf8   :  { %v2918_v6 = vsel %vm437_vm15, %v2317_v51, %v453_v0  ;;  %v451_v7 = vmul.f32 0.2, %v410_v59 }
  0xf9   :  { %v2922_v15 = vsel %vm209_vm0, %v184_v58, %v225_v4  ;;  %v2322_v20 = vpop.f32.mrb[16].mxu0  ;;  %v2340_v34 = vpop.f32.mrb[16].mxu1 }
  0xfa   :  { %v2924_v24 = vsel %vm435_vm1, %v410_v59, %v451_v7  ;;  %vm666_vm2 = vcmp.gt.f32.partialorder %v2322_v20, 0.0  ;;  %v682_v31 = vmul.f32 0.2, %v2322_v20  ;;  %v601_v35 = vpop.f32.mrb[17].mxu0  ;;  %vm908_vm3 = vcmp.gt.f32.partialorder %v2340_v34, 0.0  ;;  %v843_v40 = vpop.f32.mrb[17].mxu1 }
  0xfb   :  { %v924_v39 = vmul.f32 0.2, %v2340_v34  ;;  %vm664_vm4 = vcmp.gt.f32.partialorder %v601_v35, 0.0  ;;  %v2323_v42 = vpop.f32.mrb[18].mxu0  ;;  %v680_v48 = vmul.f32 0.2, %v601_v35 }
  0xfc   :  { %v698_v44 = vsel %vm666_vm2, %v2322_v20, %v682_v31  ;;  %v922_v51 = vmul.f32 0.2, %v843_v40  ;;  %v2341_v56 = vpop.f32.mrb[18].mxu1  ;;  %vm906_vm5 = vcmp.gt.f32.partialorder %v843_v40, 0.0  ;;  %vm667_vm6 = vcmp.gt.f32.partialorder %v2323_v42, 0.0  ;;  %v604_v0 = vpop.f32.mrb[19].mxu0 }
  0xfd   :  { %v2931_v58 = vmax.f32 %v472_v16, %v698_v44  ;;  %v683_v59 = vmul.f32 0.2, %v2323_v42  ;;  %v846_v4 = vpop.f32.mrb[19].mxu1  ;;  %v2933_v7 = vsel %vm908_vm3, %v2340_v34, %v924_v39  ;;  %v696_v36 = vsel %vm664_vm4, %v601_v35, %v680_v48 }
  0xfe   :  { %vm909_vm7 = vcmp.gt.f32.partialorder %v2341_v56, 0.0  ;;  %v925_v9 = vmul.f32 0.2, %v2341_v56  ;;  %v2940_v31 = vmax.f32 %v470_v22, %v696_v36  ;;  %vm665_vm8 = vcmp.gt.f32.partialorder %v604_v0, 0.0 }
  0xff   :  { %v956_v20 = vmax.f32 %v2931_v58, %v2933_v7  ;;  %v699_v8 = vsel %vm667_vm6, %v2323_v42, %v683_v59  ;;  %v2942_v11 = vsel %vm906_vm5, %v843_v40, %v922_v51  ;;  %v681_v34 = vmul.f32 0.2, %v604_v0 }
 0x100   :  { %v2947_v16 = vmax.f32 %v473_v28, %v699_v8  ;;  %vm907_vm9 = vcmp.gt.f32.partialorder %v846_v4, 0.0  ;;  %v954_v35 = vmax.f32 %v2940_v31, %v2942_v11  ;;  %v2951_v39 = vsel %vm909_vm7, %v2341_v56, %v925_v9 }
 0x101   :  { %v923_v44 = vmul.f32 0.2, %v846_v4  ;;  %v2326_v12 = vpop.f32.mrb[20].mxu0  ;;  %v697_v22 = vsel %vm665_vm8, %v604_v0, %v681_v34  ;;  %v2344_v40 = vpop.f32.mrb[20].mxu1 }
 0x102   :  { %v957_v19 = vmax.f32 %v2947_v16, %v2951_v39  ;;  %vm670_vm10 = vcmp.gt.f32.partialorder %v2326_v12, 0.0  ;;  %v686_v36 = vmul.f32 0.2, %v2326_v12  ;;  %v617_v42 = vpop.f32.mrb[21].mxu0  ;;  %v2958_v23 = vmax.f32 %v471_v33, %v697_v22  ;;  %v859_v9 = vpop.f32.mrb[21].mxu1 }
 0x103   :  { %v2960_v25 = vsel %vm907_vm9, %v846_v4, %v923_v44  ;;  %vm912_vm11 = vcmp.gt.f32.partialorder %v2344_v40, 0.0  ;;  %v928_v28 = vmul.f32 0.2, %v2344_v40  ;;  %v2327_v48 = vpop.f32.mrb[22].mxu0  ;;  %vm668_vm12 = vcmp.gt.f32.partialorder %v617_v42, 0.0  ;;  %v2345_v59 = vpop.f32.mrb[22].mxu1 }
 0x104   :  { %v702_v51 = vsel %vm670_vm10, %v2326_v12, %v686_v36  ;;  %v684_v56 = vmul.f32 0.2, %v617_v42  ;;  %vm910_vm13 = vcmp.gt.f32.partialorder %v859_v9, 0.0  ;;  %v620_v0 = vpop.f32.mrb[23].mxu0  ;;  %v955_v8 = vmax.f32 %v2958_v23, %v2960_v25  ;;  %v862_v4 = vpop.f32.mrb[23].mxu1 }
 0x105   :  { %v2967_v26 = vmax.f32 %v476_v45, %v702_v51  ;;  %v2969_v29 = vsel %vm912_vm11, %v2344_v40, %v928_v28  ;;  %v926_v33 = vmul.f32 0.2, %v859_v9  ;;  %vm671_vm14 = vcmp.gt.f32.partialorder %v2327_v48, 0.0 }
 0x106   :  { %v700_v34 = vsel %vm668_vm12, %v617_v42, %v684_v56  ;;  %v687_v44 = vmul.f32 0.2, %v2327_v48  ;;  %vm913_vm15 = vcmp.gt.f32.partialorder %v2345_v59, 0.0  ;;  %v929_v37 = vmul.f32 0.2, %v2345_v59 }
 0x107   :  { %v960_v12 = vmax.f32 %v2967_v26, %v2969_v29  ;;  %v2976_v22 = vmax.f32 %v474_v49, %v700_v34  ;;  %v2978_v36 = vsel %vm910_vm13, %v859_v9, %v926_v33  ;;  %vm669_vm0 = vcmp.gt.f32.partialorder %v620_v0, 0.0 }
 0x108   :  { %v703_v41 = vsel %vm671_vm14, %v2327_v48, %v687_v44  ;;  %v685_v45 = vmul.f32 0.2, %v620_v0  ;;  %vm911_vm1 = vcmp.gt.f32.partialorder %v862_v4, 0.0  ;;  %v927_v28 = vmul.f32 0.2, %v862_v4 }
 0x109   :  { %v958_v40 = vmax.f32 %v2976_v22, %v2978_v36  ;;  %v2985_v42 = vmax.f32 %v477_v54, %v703_v41  ;;  %v2330_v51 = vpop.f32.mrb[24].mxu0  ;;  %v2987_v46 = vsel %vm913_vm15, %v2345_v59, %v929_v37  ;;  %v2348_v9 = vpop.f32.mrb[24].mxu1 }
 0x10a   :  { %v701_v47 = vsel %vm669_vm0, %v620_v0, %v685_v45  ;;  %vm674_vm2 = vcmp.gt.f32.partialorder %v2330_v51, 0.0  ;;  %v690_v49 = vmul.f32 0.2, %v2330_v51  ;;  %v633_v48 = vpop.f32.mrb[25].mxu0  ;;  %v2996_v50 = vsel %vm911_vm1, %v862_v4, %v927_v28  ;;  %v875_v52 = vpop.f32.mrb[25].mxu1 }
 0x10b   :  { %v961_v56 = vmax.f32 %v2985_v42, %v2987_v46  ;;  %v2994_v33 = vmax.f32 %v475_v61, %v701_v47  ;;  %vm916_vm3 = vcmp.gt.f32.partialorder %v2348_v9, 0.0  ;;  %v2331_v54 = vpop.f32.mrb[26].mxu0  ;;  %v932_v34 = vmul.f32 0.2, %v2348_v9  ;;  %v2349_v44 = vpop.f32.mrb[26].mxu1 }
 0x10c   :  { %v706_v59 = vsel %vm674_vm2, %v2330_v51, %v690_v49  ;;  %vm672_vm4 = vcmp.gt.f32.partialorder %v633_v48, 0.0  ;;  %v688_v0 = vmul.f32 0.2, %v633_v48  ;;  %vm914_vm5 = vcmp.gt.f32.partialorder %v875_v52, 0.0  ;;  %v636_v57 = vpop.f32.mrb[27].mxu0  ;;  %v878_v61 = vpop.f32.mrb[27].mxu1 }
 0x10d   :  { %v959_v37 = vmax.f32 %v2994_v33, %v2996_v50  ;;  %v3003_v41 = vmax.f32 %v480_v10, %v706_v59  ;;  %v930_v55 = vmul.f32 0.2, %v875_v52  ;;  %v3005_v4 = vsel %vm916_vm3, %v2348_v9, %v932_v34 }
 0x10e   :  { %v704_v45 = vsel %vm672_vm4, %v633_v48, %v688_v0  ;;  %vm675_vm6 = vcmp.gt.f32.partialorder %v2331_v54, 0.0  ;;  %v691_v28 = vmul.f32 0.2, %v2331_v54  ;;  %vm917_vm7 = vcmp.gt.f32.partialorder %v2349_v44, 0.0 }
 0x10f   :  { %v964_v51 = vmax.f32 %v3003_v41, %v3005_v4  ;;  %v3012_v47 = vmax.f32 %v478_v17, %v704_v45  ;;  %v3014_v1 = vsel %vm914_vm5, %v875_v52, %v930_v55  ;;  %v933_v10 = vmul.f32 0.2, %v2349_v44 }
 0x110   :  { %v707_v5 = vsel %vm675_vm6, %v2331_v54, %v691_v28  ;;  %vm673_vm8 = vcmp.gt.f32.partialorder %v636_v57, 0.0  ;;  %v689_v49 = vmul.f32 0.2, %v636_v57  ;;  %vm915_vm9 = vcmp.gt.f32.partialorder %v878_v61, 0.0 }
 0x111   :  { %v962_v9 = vmax.f32 %v3012_v47, %v3014_v1  ;;  %v3021_v48 = vmax.f32 %v481_v27, %v707_v5  ;;  %v931_v59 = vmul.f32 0.2, %v878_v61  ;;  %v2334_v13 = vpop.f32.mrb[28].mxu0  ;;  %v3023_v14 = vsel %vm917_vm7, %v2349_v44, %v933_v10  ;;  %v2352_v54 = vpop.f32.mrb[28].mxu1 }
 0x112   :  { %v705_v17 = vsel %vm673_vm8, %v636_v57, %v689_v49  ;;  %vm678_vm10 = vcmp.gt.f32.partialorder %v2334_v13, 0.0  ;;  %v694_v52 = vmul.f32 0.2, %v2334_v13  ;;  %v649_v34 = vpop.f32.mrb[29].mxu0  ;;  %vm920_vm11 = vcmp.gt.f32.partialorder %v2352_v54, 0.0  ;;  %v891_v21 = vpop.f32.mrb[29].mxu1 }
 0x113   :  { %v965_v0 = vmax.f32 %v3021_v48, %v3023_v14  ;;  %v3030_v55 = vmax.f32 %v479_v38, %v705_v17  ;;  %v3032_v18 = vsel %vm915_vm9, %v878_v61, %v931_v59  ;;  %v2335_v27 = vpop.f32.mrb[30].mxu0  ;;  %v936_v45 = vmul.f32 0.2, %v2352_v54  ;;  %v2353_v28 = vpop.f32.mrb[30].mxu1 }
 0x114   :  { %v710_v44 = vsel %vm678_vm10, %v2334_v13, %v694_v52  ;;  %vm676_vm12 = vcmp.gt.f32.partialorder %v649_v34, 0.0  ;;  %v692_v57 = vmul.f32 0.2, %v649_v34  ;;  %vm918_vm13 = vcmp.gt.f32.partialorder %v891_v21, 0.0  ;;  %v652_v32 = vpop.f32.mrb[31].mxu0  ;;  %v894_v38 = vpop.f32.mrb[31].mxu1 }
 0x115   :  { %v963_v5 = vmax.f32 %v3030_v55, %v3032_v18  ;;  %v3039_v10 = vmax.f32 %v484_v60, %v710_v44  ;;  %v934_v30 = vmul.f32 0.2, %v891_v21  ;;  %v3041_v61 = vsel %vm920_vm11, %v2352_v54, %v936_v45 }
 0x116   :  { %v708_v49 = vsel %vm676_vm12, %v649_v34, %v692_v57  ;;  %vm679_vm14 = vcmp.gt.f32.partialorder %v2335_v27, 0.0  ;;  %v695_v59 = vmul.f32 0.2, %v2335_v27  ;;  %vm921_vm15 = vcmp.gt.f32.partialorder %v2353_v28, 0.0 }
 0x117   :  { %v968_v13 = vmax.f32 %v3039_v10, %v3041_v61  ;;  %v3048_v17 = vmax.f32 %v482_v2, %v708_v49  ;;  %v3050_v43 = vsel %vm918_vm13, %v891_v21, %v934_v30  ;;  %v937_v60 = vmul.f32 0.2, %v2353_v28 }
 0x118   :  { %v711_v53 = vsel %vm679_vm14, %v2335_v27, %v695_v59  ;;  %vm677_vm0 = vcmp.gt.f32.partialorder %v652_v32, 0.0  ;;  %v693_v52 = vmul.f32 0.2, %v652_v32  ;;  %v3279_v34 = vmax.f32 %v2916_v3, %v2918_v6 }
 0x119   :  { %v966_v54 = vmax.f32 %v3048_v17, %v3050_v43  ;;  %vm919_vm1 = vcmp.gt.f32.partialorder %v894_v38, 0.0  ;;  %v935_v45 = vmul.f32 0.2, %v894_v38  ;;  %v2358_v62 = vpop.f32.mrb[32].mxu0  ;;  %v3059_v63 = vsel %vm921_vm15, %v2353_v28, %v937_v60  ;;  %v2376_v27 = vpop.f32.mrb[32].mxu1 }
 0x11a   :  { %v3057_v44 = vmax.f32 %v3279_v34, %v711_v53  ;;  %v709_v2 = vsel %vm677_vm0, %v652_v32, %v693_v52  ;;  %vm1150_vm2 = vcmp.gt.f32.partialorder %v2358_v62, 0.0  ;;  %v1166_v21 = vmul.f32 0.2, %v2358_v62  ;;  %v1085_v57 = vpop.f32.mrb[33].mxu0  ;;  %v1327_v6 = vpop.f32.mrb[33].mxu1 }
 0x11b   :  { %v3280_v49 = vmax.f32 %v2922_v15, %v2924_v24  ;;  %v3068_v3 = vsel %vm919_vm1, %v894_v38, %v935_v45  ;;  %vm1392_vm3 = vcmp.gt.f32.partialorder %v2376_v27, 0.0  ;;  %v2359_v53 = vpop.f32.mrb[34].mxu0  ;;  %v1408_v60 = vmul.f32 0.2, %v2376_v27  ;;  %v2377_v52 = vpop.f32.mrb[34].mxu1 }
 0x11c   :  { %v1182_v28 = vsel %vm1150_vm2, %v2358_v62, %v1166_v21  ;;  %vm1148_vm4 = vcmp.gt.f32.partialorder %v1085_v57, 0.0  ;;  %v1164_v32 = vmul.f32 0.2, %v1085_v57  ;;  %vm1390_vm5 = vcmp.gt.f32.partialorder %v1327_v6, 0.0  ;;  %v1088_v24 = vpop.f32.mrb[35].mxu0  ;;  %v1330_v38 = vpop.f32.mrb[35].mxu1 }
 0x11d   :  { %v3066_v59 = vmax.f32 %v3280_v49, %v709_v2  ;;  %v3075_v30 = vmax.f32 %v956_v20, %v1182_v28  ;;  %v1406_v15 = vmul.f32 0.2, %v1327_v6  ;;  %v3077_v45 = vsel %vm1392_vm3, %v2376_v27, %v1408_v60 }
 0x11e   :  { %v1180_v2 = vsel %vm1148_vm4, %v1085_v57, %v1164_v32  ;;  %vm1151_vm6 = vcmp.gt.f32.partialorder %v2359_v53, 0.0  ;;  %v1167_v62 = vmul.f32 0.2, %v2359_v53  ;;  %vm1393_vm7 = vcmp.gt.f32.partialorder %v2377_v52, 0.0 }
 0x11f   :  { %v967_v34 = vmax.f32 %v3066_v59, %v3068_v3  ;;  %v1440_v21 = vmax.f32 %v3075_v30, %v3077_v45  ;;  %v3084_v49 = vmax.f32 %v954_v35, %v1180_v2  ;;  %v3086_v58 = vsel %vm1390_vm5, %v1327_v6, %v1406_v15 }
 0x120   :  { %v1183_v7 = vsel %vm1151_vm6, %v2359_v53, %v1167_v62  ;;  %v1409_v20 = vmul.f32 0.2, %v2377_v52  ;;  %vm1149_vm8 = vcmp.gt.f32.partialorder %v1088_v24, 0.0  ;;  %v1165_v28 = vmul.f32 0.2, %v1088_v24 }
 0x121   :  { %v1438_v27 = vmax.f32 %v3084_v49, %v3086_v58  ;;  %v3093_v57 = vmax.f32 %v957_v19, %v1183_v7  ;;  %vm1391_vm9 = vcmp.gt.f32.partialorder %v1330_v38, 0.0  ;;  %v1407_v60 = vmul.f32 0.2, %v1330_v38  ;;  %v2362_v31 = vpop.f32.mrb[36].mxu0  ;;  %v2380_v53 = vpop.f32.mrb[36].mxu1 }
 0x122   :  { %v3095_v11 = vsel %vm1393_vm7, %v2377_v52, %v1409_v20  ;;  %v1181_v35 = vsel %vm1149_vm8, %v1088_v24, %v1165_v28  ;;  %vm1154_vm10 = vcmp.gt.f32.partialorder %v2362_v31, 0.0  ;;  %v1170_v6 = vmul.f32 0.2, %v2362_v31  ;;  %v1101_v32 = vpop.f32.mrb[37].mxu0  ;;  %v1343_v39 = vpop.f32.mrb[37].mxu1 }
 0x123   :  { %v1441_v15 = vmax.f32 %v3093_v57, %v3095_v11  ;;  %v3102_v2 = vmax.f32 %v955_v8, %v1181_v35  ;;  %v3104_v16 = vsel %vm1391_vm9, %v1330_v38, %v1407_v60  ;;  %vm1396_vm11 = vcmp.gt.f32.partialorder %v2380_v53, 0.0  ;;  %v2363_v19 = vpop.f32.mrb[38].mxu0  ;;  %v2381_v7 = vpop.f32.mrb[38].mxu1 }
 0x124   :  { %v1186_v52 = vsel %vm1154_vm10, %v2362_v31, %v1170_v6  ;;  %v1412_v62 = vmul.f32 0.2, %v2380_v53  ;;  %vm1152_vm12 = vcmp.gt.f32.partialorder %v1101_v32, 0.0  ;;  %v1168_v24 = vmul.f32 0.2, %v1101_v32  ;;  %v1104_v25 = vpop.f32.mrb[39].mxu0 }
 0x125   :  { %v1439_v20 = vmax.f32 %v3102_v2, %v3104_v16  ;;  %v3111_v28 = vmax.f32 %v960_v12, %v1186_v52  ;;  %vm1394_vm13 = vcmp.gt.f32.partialorder %v1343_v39, 0.0  ;;  %v1410_v23 = vmul.f32 0.2, %v1343_v39  ;;  %v1346_v8 = vpop.f32.mrb[39].mxu1 }
 0x126   :  { %v3113_v38 = vsel %vm1396_vm11, %v2380_v53, %v1412_v62  ;;  %v1184_v60 = vsel %vm1152_vm12, %v1101_v32, %v1168_v24  ;;  %vm1155_vm14 = vcmp.gt.f32.partialorder %v2363_v19, 0.0  ;;  %v1171_v31 = vmul.f32 0.2, %v2363_v19 }
 0x127   :  { %v1444_v35 = vmax.f32 %v3111_v28, %v3113_v38  ;;  %v3120_v6 = vmax.f32 %v958_v40, %v1184_v60  ;;  %v3122_v26 = vsel %vm1394_vm13, %v1343_v39, %v1410_v23  ;;  %vm1397_vm15 = vcmp.gt.f32.partialorder %v2381_v7, 0.0 }
 0x128   :  { %v1187_v29 = vsel %vm1155_vm14, %v2363_v19, %v1171_v31  ;;  %v1413_v12 = vmul.f32 0.2, %v2381_v7  ;;  %vm1153_vm0 = vcmp.gt.f32.partialorder %v1104_v25, 0.0  ;;  %v1169_v52 = vmul.f32 0.2, %v1104_v25 }
 0x129   :  { %v1442_v53 = vmax.f32 %v3120_v6, %v3122_v26  ;;  %v3129_v32 = vmax.f32 %v961_v56, %v1187_v29  ;;  %vm1395_vm1 = vcmp.gt.f32.partialorder %v1346_v8, 0.0  ;;  %v1411_v62 = vmul.f32 0.2, %v1346_v8  ;;  %v2366_v22 = vpop.f32.mrb[40].mxu0  ;;  %v2384_v19 = vpop.f32.mrb[40].mxu1 }
 0x12a   :  { %v3131_v36 = vsel %vm1397_vm15, %v2381_v7, %v1413_v12  ;;  %v1185_v40 = vsel %vm1153_vm0, %v1104_v25, %v1169_v52  ;;  %vm1158_vm2 = vcmp.gt.f32.partialorder %v2366_v22, 0.0  ;;  %v1174_v39 = vmul.f32 0.2, %v2366_v22  ;;  %v1117_v24 = vpop.f32.mrb[41].mxu0  ;;  %v1359_v46 = vpop.f32.mrb[41].mxu1 }
 0x12b   :  { %v1445_v23 = vmax.f32 %v3129_v32, %v3131_v36  ;;  %v3138_v60 = vmax.f32 %v959_v37, %v1185_v40  ;;  %v3140_v42 = vsel %vm1395_vm1, %v1346_v8, %v1411_v62  ;;  %vm1400_vm3 = vcmp.gt.f32.partialorder %v2384_v19, 0.0  ;;  %v2367_v56 = vpop.f32.mrb[42].mxu0  ;;  %v2385_v29 = vpop.f32.mrb[42].mxu1 }
 0x12c   :  { %v1190_v7 = vsel %vm1158_vm2, %v2366_v22, %v1174_v39  ;;  %v1416_v31 = vmul.f32 0.2, %v2384_v19  ;;  %vm1156_vm4 = vcmp.gt.f32.partialorder %v1117_v24, 0.0  ;;  %v1172_v25 = vmul.f32 0.2, %v1117_v24  ;;  %v1120_v50 = vpop.f32.mrb[43].mxu0 }
 0x12d   :  { %v1443_v12 = vmax.f32 %v3138_v60, %v3140_v42  ;;  %v3147_v52 = vmax.f32 %v964_v51, %v1190_v7  ;;  %vm1398_vm5 = vcmp.gt.f32.partialorder %v1359_v46, 0.0  ;;  %v1414_v33 = vmul.f32 0.2, %v1359_v46  ;;  %v1362_v37 = vpop.f32.mrb[43].mxu1 }
 0x12e   :  { %v3149_v8 = vsel %vm1400_vm3, %v2384_v19, %v1416_v31  ;;  %v1188_v62 = vsel %vm1156_vm4, %v1117_v24, %v1172_v25  ;;  %vm1159_vm6 = vcmp.gt.f32.partialorder %v2367_v56, 0.0  ;;  %v1175_v22 = vmul.f32 0.2, %v2367_v56 }
 0x12f   :  { %v1448_v40 = vmax.f32 %v3147_v52, %v3149_v8  ;;  %v3156_v39 = vmax.f32 %v962_v9, %v1188_v62  ;;  %v3158_v41 = vsel %vm1398_vm5, %v1359_v46, %v1414_v33  ;;  %vm1401_vm7 = vcmp.gt.f32.partialorder %v2385_v29, 0.0 }
 0x130   :  { %v1191_v4 = vsel %vm1159_vm6, %v2367_v56, %v1175_v22  ;;  %v1417_v51 = vmul.f32 0.2, %v2385_v29  ;;  %vm1157_vm8 = vcmp.gt.f32.partialorder %v1120_v50, 0.0  ;;  %v1173_v7 = vmul.f32 0.2, %v1120_v50 }
 0x131   :  { %v1446_v19 = vmax.f32 %v3156_v39, %v3158_v41  ;;  %v3165_v24 = vmax.f32 %v965_v0, %v1191_v4  ;;  %vm1399_vm9 = vcmp.gt.f32.partialorder %v1362_v37, 0.0  ;;  %v1415_v31 = vmul.f32 0.2, %v1362_v37  ;;  %v2370_v47 = vpop.f32.mrb[44].mxu0  ;;  %v2388_v56 = vpop.f32.mrb[44].mxu1 }
 0x132   :  { %v3167_v1 = vsel %vm1401_vm7, %v2385_v29, %v1417_v51  ;;  %v1189_v9 = vsel %vm1157_vm8, %v1120_v50, %v1173_v7  ;;  %vm1162_vm10 = vcmp.gt.f32.partialorder %v2370_v47, 0.0  ;;  %v1178_v46 = vmul.f32 0.2, %v2370_v47  ;;  %v1133_v25 = vpop.f32.mrb[45].mxu0  ;;  %v1375_v14 = vpop.f32.mrb[45].mxu1 }
 0x133   :  { %v1449_v33 = vmax.f32 %v3165_v24, %v3167_v1  ;;  %v3174_v62 = vmax.f32 %v963_v5, %v1189_v9  ;;  %v3176_v48 = vsel %vm1399_vm9, %v1362_v37, %v1415_v31  ;;  %vm1404_vm11 = vcmp.gt.f32.partialorder %v2388_v56, 0.0  ;;  %v2371_v0 = vpop.f32.mrb[46].mxu0  ;;  %v2389_v4 = vpop.f32.mrb[46].mxu1 }
 0x134   :  { %v1194_v29 = vsel %vm1162_vm10, %v2370_v47, %v1178_v46  ;;  %v1420_v22 = vmul.f32 0.2, %v2388_v56  ;;  %vm1160_vm12 = vcmp.gt.f32.partialorder %v1133_v25, 0.0  ;;  %v1176_v50 = vmul.f32 0.2, %v1133_v25  ;;  %v1136_v18 = vpop.f32.mrb[47].mxu0 }
 0x135   :  { %v1447_v51 = vmax.f32 %v3174_v62, %v3176_v48  ;;  %v3183_v7 = vmax.f32 %v968_v13, %v1194_v29  ;;  %vm1402_vm13 = vcmp.gt.f32.partialorder %v1375_v14, 0.0  ;;  %v1418_v55 = vmul.f32 0.2, %v1375_v14  ;;  %v1378_v5 = vpop.f32.mrb[47].mxu1 }
 0x136   :  { %v3185_v37 = vsel %vm1404_vm11, %v2388_v56, %v1420_v22  ;;  %v1192_v31 = vsel %vm1160_vm12, %v1133_v25, %v1176_v50  ;;  %vm1163_vm14 = vcmp.gt.f32.partialorder %v2371_v0, 0.0  ;;  %v1179_v47 = vmul.f32 0.2, %v2371_v0 }
 0x137   :  { %v3192_v46 = vmax.f32 %v966_v54, %v1192_v31  ;;  %v3194_v10 = vsel %vm1402_vm13, %v1375_v14, %v1418_v55  ;;  %vm1405_vm15 = vcmp.gt.f32.partialorder %v2389_v4, 0.0  ;;  %v1421_v13 = vmul.f32 0.2, %v2389_v4 }
 0x138   :  { %v1195_v61 = vsel %vm1163_vm14, %v2371_v0, %v1179_v47  ;;  %vm1161_vm0 = vcmp.gt.f32.partialorder %v1136_v18, 0.0  ;;  %v1177_v29 = vmul.f32 0.2, %v1136_v18  ;;  %v3281_v25 = vmax.f32 %v3057_v44, %v3059_v63 }
 0x139   :  { %vm1403_vm1 = vcmp.gt.f32.partialorder %v1378_v5, 0.0  ;;  %v1419_v50 = vmul.f32 0.2, %v1378_v5  ;;  %v2394_v17 = vpop.f32.mrb[48].mxu0  ;;  %v3203_v43 = vsel %vm1405_vm15, %v2389_v4, %v1421_v13  ;;  %v2412_v0 = vpop.f32.mrb[48].mxu1 }
 0x13a   :  { %v3201_v22 = vmax.f32 %v3281_v25, %v1195_v61  ;;  %v1193_v54 = vsel %vm1161_vm0, %v1136_v18, %v1177_v29  ;;  %vm1634_vm2 = vcmp.gt.f32.partialorder %v2394_v17, 0.0  ;;  %v1650_v14 = vmul.f32 0.2, %v2394_v17  ;;  %v1569_v55 = vpop.f32.mrb[49].mxu0  ;;  %v1811_v63 = vpop.f32.mrb[49].mxu1 }
 0x13b   :  { %v3210_v47 = vmax.f32 %v967_v34, %v1193_v54  ;;  %v3212_v44 = vsel %vm1403_vm1, %v1378_v5, %v1419_v50  ;;  %vm1876_vm3 = vcmp.gt.f32.partialorder %v2412_v0, 0.0  ;;  %v2395_v61 = vpop.f32.mrb[50].mxu0  ;;  %v1892_v13 = vmul.f32 0.2, %v2412_v0  ;;  %v2413_v29 = vpop.f32.mrb[50].mxu1 }
 0x13c   :  { %v1666_v4 = vsel %vm1634_vm2, %v2394_v17, %v1650_v14  ;;  %vm1632_vm4 = vcmp.gt.f32.partialorder %v1569_v55, 0.0  ;;  %v1648_v18 = vmul.f32 0.2, %v1569_v55  ;;  %vm1874_vm5 = vcmp.gt.f32.partialorder %v1811_v63, 0.0  ;;  %v1572_v3 = vpop.f32.mrb[51].mxu0  ;;  %v1814_v34 = vpop.f32.mrb[51].mxu1 }
 0x13d   :  { %v1682_v31 = vmax.f32 %v1440_v21, %v1666_v4  ;;  %v1890_v59 = vmul.f32 0.2, %v1811_v63  ;;  %v1908_v5 = vsel %vm1876_vm3, %v2412_v0, %v1892_v13  ;;  %vm1635_vm6 = vcmp.gt.f32.partialorder %v2395_v61, 0.0 }
 0x13e   :  { %v1664_v50 = vsel %vm1632_vm4, %v1569_v55, %v1648_v18  ;;  %v1651_v54 = vmul.f32 0.2, %v2395_v61  ;;  %vm1877_vm7 = vcmp.gt.f32.partialorder %v2413_v29, 0.0  ;;  %v1893_v9 = vmul.f32 0.2, %v2413_v29 }
 0x13f   :  { %v1924_v17 = vmax.f32 %v1682_v31, %v1908_v5  ;;  %v1680_v14 = vmax.f32 %v1438_v27, %v1664_v50  ;;  %v1906_v56 = vsel %vm1874_vm5, %v1811_v63, %v1890_v59  ;;  %vm1633_vm8 = vcmp.gt.f32.partialorder %v1572_v3, 0.0 }
 0x140   :  { %v1667_v25 = vsel %vm1635_vm6, %v2395_v61, %v1651_v54  ;;  %v1649_v30 = vmul.f32 0.2, %v1572_v3  ;;  %vm1875_vm9 = vcmp.gt.f32.partialorder %v1814_v34, 0.0  ;;  %v1891_v0 = vmul.f32 0.2, %v1814_v34 }
 0x141   :  { %1940 = vst [vmem:[#allocation2 + $0x10] sm:$0xff] %v1924_v17  ;;  %v1922_v45 = vmax.f32 %v1680_v14, %v1906_v56  ;;  %v1683_v21 = vmax.f32 %v1441_v15, %v1667_v25  ;;  %v2398_v55 = vpop.f32.mrb[52].mxu0  ;;  %v1909_v31 = vsel %vm1877_vm7, %v2413_v29, %v1893_v9  ;;  %v2416_v58 = vpop.f32.mrb[52].mxu1 }
 0x142   :  { %v1665_v4 = vsel %vm1633_vm8, %v1572_v3, %v1649_v30  ;;  %vm1638_vm10 = vcmp.gt.f32.partialorder %v2398_v55, 0.0  ;;  %v1654_v49 = vmul.f32 0.2, %v2398_v55  ;;  %v1585_v27 = vpop.f32.mrb[53].mxu0  ;;  %v1907_v56 = vsel %vm1875_vm9, %v1814_v34, %v1891_v0  ;;  %v1827_v13 = vpop.f32.mrb[53].mxu1 }
 0x143   :  { %1938 = vst [vmem:[#allocation2] sm:$0xff] %v1922_v45  ;;  %v1925_v63 = vmax.f32 %v1683_v21, %v1909_v31  ;;  %v1681_v61 = vmax.f32 %v1439_v20, %v1665_v4  ;;  %vm1880_vm11 = vcmp.gt.f32.partialorder %v2416_v58, 0.0  ;;  %v2399_v57 = vpop.f32.mrb[54].mxu0  ;;  %v1896_v15 = vmul.f32 0.2, %v2416_v58  ;;  %v2417_v9 = vpop.f32.mrb[54].mxu1 }
 0x144   :  { %v1670_v11 = vsel %vm1638_vm10, %v2398_v55, %v1654_v49  ;;  %vm1636_vm12 = vcmp.gt.f32.partialorder %v1585_v27, 0.0  ;;  %v1652_v18 = vmul.f32 0.2, %v1585_v27  ;;  %vm1878_vm13 = vcmp.gt.f32.partialorder %v1827_v13, 0.0  ;;  %v1588_v3 = vpop.f32.mrb[55].mxu0  ;;  %v1830_v2 = vpop.f32.mrb[55].mxu1 }
 0x145   :  { %1941 = vst [vmem:[#allocation2 + $0x18] sm:$0xff] %v1925_v63  ;;  %v1923_v29 = vmax.f32 %v1681_v61, %v1907_v56  ;;  %v1686_v25 = vmax.f32 %v1444_v35, %v1670_v11  ;;  %v1894_v59 = vmul.f32 0.2, %v1827_v13  ;;  %v1912_v16 = vsel %vm1880_vm11, %v2416_v58, %v1896_v15 }
 0x146   :  { %v1668_v20 = vsel %vm1636_vm12, %v1585_v27, %v1652_v18  ;;  %vm1639_vm14 = vcmp.gt.f32.partialorder %v2399_v57, 0.0  ;;  %v1655_v34 = vmul.f32 0.2, %v2399_v57  ;;  %vm1881_vm15 = vcmp.gt.f32.partialorder %v2417_v9, 0.0 }
 0x147   :  { %1939 = vst [vmem:[#allocation2 + $0x8] sm:$0xff] %v1923_v29  ;;  %v1928_v5 = vmax.f32 %v1686_v25, %v1912_v16  ;;  %v1684_v50 = vmax.f32 %v1442_v53, %v1668_v20  ;;  %v1910_v54 = vsel %vm1878_vm13, %v1827_v13, %v1894_v59  ;;  %v1897_v14 = vmul.f32 0.2, %v2417_v9 }
 0x148   :  { %v1671_v17 = vsel %vm1639_vm14, %v2399_v57, %v1655_v34  ;;  %vm1637_vm0 = vcmp.gt.f32.partialorder %v1588_v3, 0.0  ;;  %v1653_v28 = vmul.f32 0.2, %v1588_v3  ;;  %vm1879_vm1 = vcmp.gt.f32.partialorder %v1830_v2, 0.0 }
 0x149   :  { %1944 = vst [vmem:[#allocation2 + $0x30] sm:$0xff] %v1928_v5  ;;  %v1926_v38 = vmax.f32 %v1684_v50, %v1910_v54  ;;  %v1687_v35 = vmax.f32 %v1445_v23, %v1671_v17  ;;  %v1895_v30 = vmul.f32 0.2, %v1830_v2  ;;  %v2402_v45 = vpop.f32.mrb[56].mxu0  ;;  %v1913_v21 = vsel %vm1881_vm15, %v2417_v9, %v1897_v14  ;;  %v2420_v26 = vpop.f32.mrb[56].mxu1 }
 0x14a   :  { %v1669_v0 = vsel %vm1637_vm0, %v1588_v3, %v1653_v28  ;;  %vm1642_vm2 = vcmp.gt.f32.partialorder %v2402_v45, 0.0  ;;  %v1658_v6 = vmul.f32 0.2, %v2402_v45  ;;  %v1601_v53 = vpop.f32.mrb[57].mxu0  ;;  %vm1884_vm3 = vcmp.gt.f32.partialorder %v2420_v26, 0.0  ;;  %v1843_v49 = vpop.f32.mrb[57].mxu1 }
 0x14b   :  { %1942 = vst [vmem:[#allocation2 + $0x20] sm:$0xff] %v1926_v38  ;;  %v1929_v55 = vmax.f32 %v1687_v35, %v1913_v21  ;;  %v1685_v31 = vmax.f32 %v1443_v12, %v1669_v0  ;;  %v1911_v4 = vsel %vm1879_vm1, %v1830_v2, %v1895_v30  ;;  %v2403_v32 = vpop.f32.mrb[58].mxu0  ;;  %v1900_v23 = vmul.f32 0.2, %v2420_v26  ;;  %v2421_v27 = vpop.f32.mrb[58].mxu1 }
 0x14c   :  { %v1674_v36 = vsel %vm1642_vm2, %v2402_v45, %v1658_v6  ;;  %vm1640_vm4 = vcmp.gt.f32.partialorder %v1601_v53, 0.0  ;;  %v1656_v58 = vmul.f32 0.2, %v1601_v53  ;;  %vm1882_vm5 = vcmp.gt.f32.partialorder %v1843_v49, 0.0  ;;  %v1604_v13 = vpop.f32.mrb[59].mxu0  ;;  %v1846_v60 = vpop.f32.mrb[59].mxu1 }
 0x14d   :  { %1945 = vst [vmem:[#allocation2 + $0x38] sm:$0xff] %v1929_v55  ;;  %v1927_v63 = vmax.f32 %v1685_v31, %v1911_v4  ;;  %v1690_v61 = vmax.f32 %v1448_v40, %v1674_v36  ;;  %v1898_v56 = vmul.f32 0.2, %v1843_v49  ;;  %v1916_v42 = vsel %vm1884_vm3, %v2420_v26, %v1900_v23 }
 0x14e   :  { %v1672_v12 = vsel %vm1640_vm4, %v1601_v53, %v1656_v58  ;;  %vm1643_vm6 = vcmp.gt.f32.partialorder %v2403_v32, 0.0  ;;  %v1659_v57 = vmul.f32 0.2, %v2403_v32  ;;  %vm1885_vm7 = vcmp.gt.f32.partialorder %v2421_v27, 0.0 }
 0x14f   :  { %1943 = vst [vmem:[#allocation2 + $0x28] sm:$0xff] %v1927_v63  ;;  %v1932_v11 = vmax.f32 %v1690_v61, %v1916_v42  ;;  %v1688_v15 = vmax.f32 %v1446_v19, %v1672_v12  ;;  %v1914_v18 = vsel %vm1882_vm5, %v1843_v49, %v1898_v56  ;;  %v1901_v29 = vmul.f32 0.2, %v2421_v27 }
 0x150   :  { %v1675_v9 = vsel %vm1643_vm6, %v2403_v32, %v1659_v57  ;;  %vm1641_vm8 = vcmp.gt.f32.partialorder %v1604_v13, 0.0  ;;  %v1657_v52 = vmul.f32 0.2, %v1604_v13  ;;  %vm1883_vm9 = vcmp.gt.f32.partialorder %v1846_v60, 0.0 }
 0x151   :  { %1948 = vst [vmem:[#allocation2 + $0x50] sm:$0xff] %v1932_v11  ;;  %v1930_v8 = vmax.f32 %v1688_v15, %v1914_v18  ;;  %v1691_v40 = vmax.f32 %v1449_v33, %v1675_v9  ;;  %v1899_v25 = vmul.f32 0.2, %v1846_v60  ;;  %v2406_v59 = vpop.f32.mrb[60].mxu0  ;;  %v1917_v3 = vsel %vm1885_vm7, %v2421_v27, %v1901_v29  ;;  %v2424_v41 = vpop.f32.mrb[60].mxu1 }
 0x152   :  { %v1673_v2 = vsel %vm1641_vm8, %v1604_v13, %v1657_v52  ;;  %vm1646_vm10 = vcmp.gt.f32.partialorder %v2406_v59, 0.0  ;;  %v1662_v39 = vmul.f32 0.2, %v2406_v59  ;;  %v1617_v19 = vpop.f32.mrb[61].mxu0  ;;  %vm1888_vm11 = vcmp.gt.f32.partialorder %v2424_v41, 0.0  ;;  %v1859_v5 = vpop.f32.mrb[61].mxu1 }
 0x153   :  { %1946 = vst [vmem:[#allocation2 + $0x40] sm:$0xff] %v1930_v8  ;;  %v1933_v16 = vmax.f32 %v1691_v40, %v1917_v3  ;;  %v1689_v20 = vmax.f32 %v1447_v51, %v1673_v2  ;;  %v1915_v34 = vsel %vm1883_vm9, %v1846_v60, %v1899_v25  ;;  %v2407_v24 = vpop.f32.mrb[62].mxu0  ;;  %v1904_v33 = vmul.f32 0.2, %v2424_v41  ;;  %v2425_v54 = vpop.f32.mrb[62].mxu1 }
 0x154   :  { %v1678_v1 = vsel %vm1646_vm10, %v2406_v59, %v1662_v39  ;;  %vm1644_vm12 = vcmp.gt.f32.partialorder %v1617_v19, 0.0  ;;  %v1660_v50 = vmul.f32 0.2, %v1617_v19  ;;  %v3282_v14 = vmax.f32 %v3183_v7, %v3185_v37  ;;  %v1620_v35 = vpop.f32.mrb[63].mxu0  ;;  %v1862_v62 = vpop.f32.mrb[63].mxu1 }
 0x155   :  { %1949 = vst [vmem:[#allocation2 + $0x58] sm:$0xff] %v1933_v16  ;;  %v1931_v17 = vmax.f32 %v1689_v20, %v1915_v34  ;;  %vm1886_vm13 = vcmp.gt.f32.partialorder %v1859_v5, 0.0  ;;  %v1902_v38 = vmul.f32 0.2, %v1859_v5  ;;  %v1920_v48 = vsel %vm1888_vm11, %v2424_v41, %v1904_v33 }
 0x156   :  { %v1694_v28 = vmax.f32 %v3282_v14, %v1678_v1  ;;  %v1676_v51 = vsel %vm1644_vm12, %v1617_v19, %v1660_v50  ;;  %vm1647_vm14 = vcmp.gt.f32.partialorder %v2407_v24, 0.0  ;;  %v1663_v30 = vmul.f32 0.2, %v2407_v24 }
 0x157   :  { %1947 = vst [vmem:[#allocation2 + $0x48] sm:$0xff] %v1931_v17  ;;  %v3283_v21 = vmax.f32 %v3192_v46, %v3194_v10  ;;  %v1918_v6 = vsel %vm1886_vm13, %v1859_v5, %v1902_v38  ;;  %vm1889_vm15 = vcmp.gt.f32.partialorder %v2425_v54, 0.0  ;;  %v1905_v53 = vmul.f32 0.2, %v2425_v54 }
 0x158   :  { %v1936_v45 = vmax.f32 %v1694_v28, %v1920_v48  ;;  %v1679_v26 = vsel %vm1647_vm14, %v2407_v24, %v1663_v30  ;;  %vm1645_vm0 = vcmp.gt.f32.partialorder %v1620_v35, 0.0  ;;  %v1661_v7 = vmul.f32 0.2, %v1620_v35 }
 0x159   :  { %v1692_v0 = vmax.f32 %v3283_v21, %v1676_v51  ;;  %v3284_v55 = vmax.f32 %v3201_v22, %v3203_v43  ;;  %vm1887_vm1 = vcmp.gt.f32.partialorder %v1862_v62, 0.0  ;;  %v1903_v4 = vmul.f32 0.2, %v1862_v62 }
 0x15a   :  { %1952 = vst [vmem:[#allocation2 + $0x70] sm:$0xff] %v1936_v45  ;;  %v1921_v49 = vsel %vm1889_vm15, %v2425_v54, %v1905_v53  ;;  %v1677_v32 = vsel %vm1645_vm0, %v1620_v35, %v1661_v7  ;;  %v3285_v10 = vmax.f32 %v3210_v47, %v3212_v44 }
 0x15b   :  { %v1934_v37 = vmax.f32 %v1692_v0, %v1918_v6  ;;  %v1695_v31 = vmax.f32 %v3284_v55, %v1679_v26  ;;  %v1919_v23 = vsel %vm1887_vm1, %v1862_v62, %v1903_v4 }
 0x15c   :  { %v1693_v36 = vmax.f32 %v3285_v10, %v1677_v32 }
 0x15d   :  { %1950 = vst [vmem:[#allocation2 + $0x60] sm:$0xff] %v1934_v37  ;;  %v1937_v46 = vmax.f32 %v1695_v31, %v1921_v49 }
 0x15e   :  { %v1935_v58 = vmax.f32 %v1693_v36, %v1919_v23 }
 0x15f   :  { %1953 = vst [vmem:[#allocation2 + $0x78] sm:$0xff] %v1937_v46 }
 0x160   :  { %1951 = vst [vmem:[#allocation2 + $0x68] sm:$0xff] %v1935_v58 }
 0x161   :  { %2512 = shalt.err (!%p2509_p4)
}
 0x162   :  { %s2513_s26 = scalar_lea.hbm %s3278_s2, 2048 }
 0x163   :  { %p2514_p5 = scmp.ne.s32.totalorder %s3278_s2, %s2513_s26  ;;  %p2517_p6 = scmp.lt.u32.totalorder %s2513_s26, %s3278_s2 }
 0x165   :  { %p2519_p7 = pnand %p2517_p6, %p2514_p5 }
 0x167   :  { %2522 = shalt.err (!%p2519_p7)
}
 0x168   :  { %s2526_s3 = smov 128   ;;  %s2527_s4 = smov 8  }
 0x169   :  { %1965 = dma.vmem_to_hbm [thread:$0]  %s1960_s22, 2048, %s3278_s2, [#allocation3], %s2526_s3, %s2526_s3, %s2527_s4  }
 0x16a   :  { %2523 = dma.done.wait [#allocation3], 2048  }
 0x16b   :  { %2524 = vsyncadd [#allocation3], 4294965248 }
 0x16c   :  { %1969 = vsyncpa [#allocation3], 1 }

</bundles_post_ra>
